<compile_context>
chip_gen: v6e
topology: v6e:2x2x1
jax: 0.10.0
libtpu: 0.0.40
codegen_flags: <defaults>
</compile_context>

<pallas_src>
import functools

import jax
import jax.numpy as jnp
from jax.experimental import pallas as pl
from jax.experimental.pallas import tpu as pltpu


def patch_embed_kernel(x_ref, w_ref, posb_ref, cls_ref, out_ref, lhs_ref, *,
                       C, PH, PW, compute_dtype):
    """One grid step == one image.

    x_ref:    (1, C, NH, PH, NW, PW)  raw NCHW pixels (free metadata reshape)
    w_ref:    (K, D)   projection weight, K rows ordered (c, ph, pw), compute_dtype
    posb_ref: (N, D)   pos_embed[1:] + linear bias, f32
    cls_ref:  (1, D)   cls + pos_embed[0]
    out_ref:  (1, N+1, D)
    lhs_ref:  (NH, NW, K) f32 VMEM scratch -- token-major patch matrix
    """
    NH, NW, K = lhs_ref.shape
    N = NH * NW

    # Patchify: place each (c, ph)-plane of the image into its K-column slot.
    # C*PH short, independent VMEM copies; live ranges are one statement each.
    for c in range(C):
        for i in range(PH):
            col = (c * PH + i) * PW
            lhs_ref[:, :, col:col + PW] = x_ref[0, c, :, i, :, :]

    # Single full-depth MXU contraction: (N, K) @ (K, D) with f32 accumulate.
    lhs = lhs_ref[...].reshape(N, K).astype(compute_dtype)
    acc = jnp.dot(lhs, w_ref[...], preferred_element_type=jnp.float32)
    acc = acc + posb_ref[...]                         # pos_embed + bias (f32)

    # Write the full token axis (cls row included) -- no wrapper concat pass.
    out_ref[0, 0:1, :] = cls_ref[...].astype(out_ref.dtype)
    out_ref[0, pl.ds(1, N), :] = acc.astype(out_ref.dtype)


def patch_embedding_forward(x, w, b, cls, pos_embed, *, patch_h, patch_w,
                            compute_dtype=jnp.bfloat16):
    """x: [B, C, H, W] float32 (NCHW, matching the PyTorch module).

    w: (K, D) with K rows in torch rearrange order (ph, pw, c); b: (D,);
    cls: (1, D); pos_embed: (1, N+1, D). Returns (B, N+1, D) in x.dtype.
    """
    B, C, H, W = x.shape
    nh, nw = H // patch_h, W // patch_w
    N = nh * nw
    D = w.shape[1]
    K = C * patch_h * patch_w

    # FREE (metadata-only) reshape: NCHW -> (B, C, nh, ph, nw, pw). No HBM pass.
    x6 = x.reshape(B, C, nh, patch_h, nw, patch_w)

    # Tiny offline weight permutation: torch K order (ph, pw, c) -> (c, ph, pw)
    # to match the in-kernel gather order; cast to the MXU compute dtype.
    w2 = jnp.transpose(w.reshape(patch_h, patch_w, C, D), (2, 0, 1, 3))
    w2 = w2.reshape(K, D).astype(compute_dtype)

    # Fold the linear bias into the patch-row positional embedding (kept f32),
    # and precompute the cls row; both are tiny (N+1, D) host-side ops.
    pos2d = pos_embed.reshape(N + 1, D)
    posb = (pos2d[1:] + b).astype(jnp.float32)        # (N, D)
    cls_row = (cls + pos2d[0:1]).astype(x.dtype)      # (1, D)

    kernel = functools.partial(patch_embed_kernel, C=C, PH=patch_h, PW=patch_w,
                               compute_dtype=compute_dtype)

    return pl.pallas_call(
        kernel,
        out_shape=jax.ShapeDtypeStruct((B, N + 1, D), x.dtype),
        grid=(B,),
        in_specs=[
            # Whole image per step -> one fully contiguous HBM DMA per image.
            pl.BlockSpec((1, C, nh, patch_h, nw, patch_w),
                         lambda bi: (bi, 0, 0, 0, 0, 0)),
            # Small constant-index operands, resident across the grid.
            # TODO(synk): at real ViT sizes on v7x, single-buffer these
            # (pipeline_mode=pl.Buffered(1)) and/or emit bf16 output to save
            # VMEM / HBM write bandwidth.
            pl.BlockSpec((K, D), lambda bi: (0, 0)),
            pl.BlockSpec((N, D), lambda bi: (0, 0)),
            pl.BlockSpec((1, D), lambda bi: (0, 0)),
        ],
        out_specs=pl.BlockSpec((1, N + 1, D), lambda bi: (bi, 0, 0)),
        scratch_shapes=[pltpu.VMEM((nh, nw, K), jnp.float32)],
        compiler_params=pltpu.CompilerParams(
            dimension_semantics=("parallel",)),
    )(x6, w2, posb, cls_row)
    # Dropout(p=0.0) is the identity -> omitted.


def reference_forward(x, w, b, cls, pos_embed, *, patch_h, patch_w):
    """Plain-JAX mirror of the PyTorch module's forward."""
    B, C, H, W = x.shape
    nh, nw = H // patch_h, W // patch_w
    N = nh * nw
    K = C * patch_h * patch_w
    patches = x.reshape(B, C, nh, patch_h, nw, patch_w)
    patches = jnp.transpose(patches, (0, 2, 4, 3, 5, 1)).reshape(B, N, K)
    emb = jnp.dot(patches, w, precision=jax.lax.Precision.HIGHEST) + b
    cls_b = jnp.broadcast_to(cls[None, :, :], (B, 1, w.shape[1]))
    out = jnp.concatenate([cls_b, emb], axis=1)
    return out + pos_embed


if __name__ == "__main__":
    # Small shapes consistent with the module: NCHW input, square patches,
    # patch_embed_dimension = 4 (the config value). nw = 8 keeps the in-kernel
    # patch gather sublane-aligned.
    B, C, H, W = 2, 3, 64, 64
    PH, PW = 8, 8
    D = 4
    NH, NW = H // PH, W // PW
    N = NH * NW
    K = C * PH * PW

    key = jax.random.PRNGKey(0)
    kx, kw, kb, kc, kp = jax.random.split(key, 5)

    x = jax.random.normal(kx, (B, C, H, W), dtype=jnp.float32)
    # nn.Linear(K, D): torch weight is (D, K); store transposed (K, D) for x @ W.
    w = jax.random.normal(kw, (K, D), dtype=jnp.float32) / jnp.sqrt(jnp.float32(K))
    b = jax.random.normal(kb, (D,), dtype=jnp.float32) * 0.1
    cls = jax.random.normal(kc, (1, D), dtype=jnp.float32)
    # pos_embed is zero-initialized in torch, but use non-zero values here so
    # the positional-embedding add path is actually validated.
    pos_embed = jax.random.normal(kp, (1, N + 1, D), dtype=jnp.float32) * 0.02

    fwd = jax.jit(patch_embedding_forward,
                  static_argnames=("patch_h", "patch_w", "compute_dtype"))

    ref = reference_forward(x, w, b, cls, pos_embed, patch_h=PH, patch_w=PW)

    # f32 MXU path.
    out_f32 = jax.block_until_ready(
        fwd(x, w, b, cls, pos_embed, patch_h=PH, patch_w=PW,
            compute_dtype=jnp.float32))
    assert out_f32.shape == (B, N + 1, D)
    assert jnp.allclose(out_f32, ref, atol=2e-2, rtol=2e-2)

    # bf16 MXU path (recommended on v6e, effectively mandatory on v7x);
    # tolerance reflects bf16 operand rounding over a K=192 contraction.
    out_bf16 = jax.block_until_ready(
        fwd(x, w, b, cls, pos_embed, patch_h=PH, patch_w=PW,
            compute_dtype=jnp.bfloat16))
    assert out_bf16.shape == (B, N + 1, D)
    assert jnp.allclose(out_bf16, ref, atol=8e-2, rtol=8e-2)

    print("KERNEL_OK")
</pallas_src>

<mosaic_0001>
module attributes {stable_mosaic.version = 11 : i64} {
  func.func @patch_embed_kernel(%arg0: i32, %arg1: memref<1x3x8x8x8x8xf32, #tpu.memory_space<vmem>>, %arg2: memref<192x4xf32, #tpu.memory_space<vmem>>, %arg3: memref<64x4xf32, #tpu.memory_space<vmem>>, %arg4: memref<1x4xf32, #tpu.memory_space<vmem>>, %arg5: memref<1x65x4xf32, #tpu.memory_space<vmem>>, %arg6: memref<8x8x192xf32, #tpu.memory_space<vmem>>) attributes {dimension_semantics = [#tpu.dimension_semantics<parallel>], iteration_bounds = array<i64: 2>, scalar_prefetch = 0 : i64, scratch_operands = 1 : i64, tpu.core_type = #tpu.core_type<tc>, window_params = [{transform_indices = @transform_0, window_bounds = array<i64: 1, 3, 8, 8, 8, 8>}, {pipeline_mode = #tpu.pipeline_mode<synchronous>, transform_indices = @transform_1, window_bounds = array<i64: 192, 4>}, {pipeline_mode = #tpu.pipeline_mode<synchronous>, transform_indices = @transform_2, window_bounds = array<i64: 64, 4>}, {pipeline_mode = #tpu.pipeline_mode<synchronous>, transform_indices = @transform_3, window_bounds = array<i64: 1, 4>}, {transform_indices = @transform_4, window_bounds = array<i64: 1, 65, 4>}]} {
    %c0 = arith.constant 0 : index
    %c0_0 = arith.constant 0 : index
    %c0_1 = arith.constant 0 : index
    %c0_2 = arith.constant 0 : index
    %c0_3 = arith.constant 0 : index
    %c0_4 = arith.constant 0 : index
    %0 = vector.load %arg1[%c0, %c0_0, %c0_1, %c0_2, %c0_3, %c0_4] : memref<1x3x8x8x8x8xf32, #tpu.memory_space<vmem>>, vector<1x1x8x1x8x8xf32>
    %1 = vector.shape_cast %0 : vector<1x1x8x1x8x8xf32> to vector<8x8x8xf32>
    %c0_5 = arith.constant 0 : index
    %c0_6 = arith.constant 0 : index
    %c0_7 = arith.constant 0 : index
    %2 = vector.load %arg6[%c0_5, %c0_6, %c0_7] : memref<8x8x192xf32, #tpu.memory_space<vmem>>, vector<8x8x8xf32>
    tpu.vector_store %arg6[%c0_5, %c0_6, %c0_7], %1 {strides = array<i32>} : memref<8x8x192xf32, #tpu.memory_space<vmem>>, vector<8x8x8xf32>,
    %c0_8 = arith.constant 0 : index
    %c0_9 = arith.constant 0 : index
    %c0_10 = arith.constant 0 : index
    %c1 = arith.constant 1 : index
    %c0_11 = arith.constant 0 : index
    %c0_12 = arith.constant 0 : index
    %3 = vector.load %arg1[%c0_8, %c0_9, %c0_10, %c1, %c0_11, %c0_12] : memref<1x3x8x8x8x8xf32, #tpu.memory_space<vmem>>, vector<1x1x8x1x8x8xf32>
    %4 = vector.shape_cast %3 : vector<1x1x8x1x8x8xf32> to vector<8x8x8xf32>
    %c0_13 = arith.constant 0 : index
    %c0_14 = arith.constant 0 : index
    %c8 = arith.constant 8 : index
    %5 = vector.load %arg6[%c0_13, %c0_14, %c8] : memref<8x8x192xf32, #tpu.memory_space<vmem>>, vector<8x8x8xf32>
    tpu.vector_store %arg6[%c0_13, %c0_14, %c8], %4 {strides = array<i32>} : memref<8x8x192xf32, #tpu.memory_space<vmem>>, vector<8x8x8xf32>,
    %c0_15 = arith.constant 0 : index
    %c0_16 = arith.constant 0 : index
    %c0_17 = arith.constant 0 : index
    %c2 = arith.constant 2 : index
    %c0_18 = arith.constant 0 : index
    %c0_19 = arith.constant 0 : index
    %6 = vector.load %arg1[%c0_15, %c0_16, %c0_17, %c2, %c0_18, %c0_19] : memref<1x3x8x8x8x8xf32, #tpu.memory_space<vmem>>, vector<1x1x8x1x8x8xf32>
    %7 = vector.shape_cast %6 : vector<1x1x8x1x8x8xf32> to vector<8x8x8xf32>
    %c0_20 = arith.constant 0 : index
    %c0_21 = arith.constant 0 : index
    %c16 = arith.constant 16 : index
    %8 = vector.load %arg6[%c0_20, %c0_21, %c16] : memref<8x8x192xf32, #tpu.memory_space<vmem>>, vector<8x8x8xf32>
    tpu.vector_store %arg6[%c0_20, %c0_21, %c16], %7 {strides = array<i32>} : memref<8x8x192xf32, #tpu.memory_space<vmem>>, vector<8x8x8xf32>,
    %c0_22 = arith.constant 0 : index
    %c0_23 = arith.constant 0 : index
    %c0_24 = arith.constant 0 : index
    %c3 = arith.constant 3 : index
    %c0_25 = arith.constant 0 : index
    %c0_26 = arith.constant 0 : index
    %9 = vector.load %arg1[%c0_22, %c0_23, %c0_24, %c3, %c0_25, %c0_26] : memref<1x3x8x8x8x8xf32, #tpu.memory_space<vmem>>, vector<1x1x8x1x8x8xf32>
    %10 = vector.shape_cast %9 : vector<1x1x8x1x8x8xf32> to vector<8x8x8xf32>
    %c0_27 = arith.constant 0 : index
    %c0_28 = arith.constant 0 : index
    %c24 = arith.constant 24 : index
    %11 = vector.load %arg6[%c0_27, %c0_28, %c24] : memref<8x8x192xf32, #tpu.memory_space<vmem>>, vector<8x8x8xf32>
    tpu.vector_store %arg6[%c0_27, %c0_28, %c24], %10 {strides = array<i32>} : memref<8x8x192xf32, #tpu.memory_space<vmem>>, vector<8x8x8xf32>,
    %c0_29 = arith.constant 0 : index
    %c0_30 = arith.constant 0 : index
    %c0_31 = arith.constant 0 : index
    %c4 = arith.constant 4 : index
    %c0_32 = arith.constant 0 : index
    %c0_33 = arith.constant 0 : index
    %12 = vector.load %arg1[%c0_29, %c0_30, %c0_31, %c4, %c0_32, %c0_33] : memref<1x3x8x8x8x8xf32, #tpu.memory_space<vmem>>, vector<1x1x8x1x8x8xf32>
    %13 = vector.shape_cast %12 : vector<1x1x8x1x8x8xf32> to vector<8x8x8xf32>
    %c0_34 = arith.constant 0 : index
    %c0_35 = arith.constant 0 : index
    %c32 = arith.constant 32 : index
    %14 = vector.load %arg6[%c0_34, %c0_35, %c32] : memref<8x8x192xf32, #tpu.memory_space<vmem>>, vector<8x8x8xf32>
    tpu.vector_store %arg6[%c0_34, %c0_35, %c32], %13 {strides = array<i32>} : memref<8x8x192xf32, #tpu.memory_space<vmem>>, vector<8x8x8xf32>,
    %c0_36 = arith.constant 0 : index
    %c0_37 = arith.constant 0 : index
    %c0_38 = arith.constant 0 : index
    %c5 = arith.constant 5 : index
    %c0_39 = arith.constant 0 : index
    %c0_40 = arith.constant 0 : index
    %15 = vector.load %arg1[%c0_36, %c0_37, %c0_38, %c5, %c0_39, %c0_40] : memref<1x3x8x8x8x8xf32, #tpu.memory_space<vmem>>, vector<1x1x8x1x8x8xf32>
    %16 = vector.shape_cast %15 : vector<1x1x8x1x8x8xf32> to vector<8x8x8xf32>
    %c0_41 = arith.constant 0 : index
    %c0_42 = arith.constant 0 : index
    %c40 = arith.constant 40 : index
    %17 = vector.load %arg6[%c0_41, %c0_42, %c40] : memref<8x8x192xf32, #tpu.memory_space<vmem>>, vector<8x8x8xf32>
    tpu.vector_store %arg6[%c0_41, %c0_42, %c40], %16 {strides = array<i32>} : memref<8x8x192xf32, #tpu.memory_space<vmem>>, vector<8x8x8xf32>,
    %c0_43 = arith.constant 0 : index
    %c0_44 = arith.constant 0 : index
    %c0_45 = arith.constant 0 : index
    %c6 = arith.constant 6 : index
    %c0_46 = arith.constant 0 : index
    %c0_47 = arith.constant 0 : index
    %18 = vector.load %arg1[%c0_43, %c0_44, %c0_45, %c6, %c0_46, %c0_47] : memref<1x3x8x8x8x8xf32, #tpu.memory_space<vmem>>, vector<1x1x8x1x8x8xf32>
    %19 = vector.shape_cast %18 : vector<1x1x8x1x8x8xf32> to vector<8x8x8xf32>
    %c0_48 = arith.constant 0 : index
    %c0_49 = arith.constant 0 : index
    %c48 = arith.constant 48 : index
    %20 = vector.load %arg6[%c0_48, %c0_49, %c48] : memref<8x8x192xf32, #tpu.memory_space<vmem>>, vector<8x8x8xf32>
    tpu.vector_store %arg6[%c0_48, %c0_49, %c48], %19 {strides = array<i32>} : memref<8x8x192xf32, #tpu.memory_space<vmem>>, vector<8x8x8xf32>,
    %c0_50 = arith.constant 0 : index
    %c0_51 = arith.constant 0 : index
    %c0_52 = arith.constant 0 : index
    %c7 = arith.constant 7 : index
    %c0_53 = arith.constant 0 : index
    %c0_54 = arith.constant 0 : index
    %21 = vector.load %arg1[%c0_50, %c0_51, %c0_52, %c7, %c0_53, %c0_54] : memref<1x3x8x8x8x8xf32, #tpu.memory_space<vmem>>, vector<1x1x8x1x8x8xf32>
    %22 = vector.shape_cast %21 : vector<1x1x8x1x8x8xf32> to vector<8x8x8xf32>
    %c0_55 = arith.constant 0 : index
    %c0_56 = arith.constant 0 : index
    %c56 = arith.constant 56 : index
    %23 = vector.load %arg6[%c0_55, %c0_56, %c56] : memref<8x8x192xf32, #tpu.memory_space<vmem>>, vector<8x8x8xf32>
    tpu.vector_store %arg6[%c0_55, %c0_56, %c56], %22 {strides = array<i32>} : memref<8x8x192xf32, #tpu.memory_space<vmem>>, vector<8x8x8xf32>,
    %c0_57 = arith.constant 0 : index
    %c1_58 = arith.constant 1 : index
    %c0_59 = arith.constant 0 : index
    %c0_60 = arith.constant 0 : index
    %c0_61 = arith.constant 0 : index
    %c0_62 = arith.constant 0 : index
    %24 = vector.load %arg1[%c0_57, %c1_58, %c0_59, %c0_60, %c0_61, %c0_62] : memref<1x3x8x8x8x8xf32, #tpu.memory_space<vmem>>, vector<1x1x8x1x8x8xf32>
    %25 = vector.shape_cast %24 : vector<1x1x8x1x8x8xf32> to vector<8x8x8xf32>
    %c0_63 = arith.constant 0 : index
    %c0_64 = arith.constant 0 : index
    %c64 = arith.constant 64 : index
    %26 = vector.load %arg6[%c0_63, %c0_64, %c64] : memref<8x8x192xf32, #tpu.memory_space<vmem>>, vector<8x8x8xf32>
    tpu.vector_store %arg6[%c0_63, %c0_64, %c64], %25 {strides = array<i32>} : memref<8x8x192xf32, #tpu.memory_space<vmem>>, vector<8x8x8xf32>,
    %c0_65 = arith.constant 0 : index
    %c1_66 = arith.constant 1 : index
    %c0_67 = arith.constant 0 : index
    %c1_68 = arith.constant 1 : index
    %c0_69 = arith.constant 0 : index
    %c0_70 = arith.constant 0 : index
    %27 = vector.load %arg1[%c0_65, %c1_66, %c0_67, %c1_68, %c0_69, %c0_70] : memref<1x3x8x8x8x8xf32, #tpu.memory_space<vmem>>, vector<1x1x8x1x8x8xf32>
    %28 = vector.shape_cast %27 : vector<1x1x8x1x8x8xf32> to vector<8x8x8xf32>
    %c0_71 = arith.constant 0 : index
    %c0_72 = arith.constant 0 : index
    %c72 = arith.constant 72 : index
    %29 = vector.load %arg6[%c0_71, %c0_72, %c72] : memref<8x8x192xf32, #tpu.memory_space<vmem>>, vector<8x8x8xf32>
    tpu.vector_store %arg6[%c0_71, %c0_72, %c72], %28 {strides = array<i32>} : memref<8x8x192xf32, #tpu.memory_space<vmem>>, vector<8x8x8xf32>,
    %c0_73 = arith.constant 0 : index
    %c1_74 = arith.constant 1 : index
    %c0_75 = arith.constant 0 : index
    %c2_76 = arith.constant 2 : index
    %c0_77 = arith.constant 0 : index
    %c0_78 = arith.constant 0 : index
    %30 = vector.load %arg1[%c0_73, %c1_74, %c0_75, %c2_76, %c0_77, %c0_78] : memref<1x3x8x8x8x8xf32, #tpu.memory_space<vmem>>, vector<1x1x8x1x8x8xf32>
    %31 = vector.shape_cast %30 : vector<1x1x8x1x8x8xf32> to vector<8x8x8xf32>
    %c0_79 = arith.constant 0 : index
    %c0_80 = arith.constant 0 : index
    %c80 = arith.constant 80 : index
    %32 = vector.load %arg6[%c0_79, %c0_80, %c80] : memref<8x8x192xf32, #tpu.memory_space<vmem>>, vector<8x8x8xf32>
    tpu.vector_store %arg6[%c0_79, %c0_80, %c80], %31 {strides = array<i32>} : memref<8x8x192xf32, #tpu.memory_space<vmem>>, vector<8x8x8xf32>,
    %c0_81 = arith.constant 0 : index
    %c1_82 = arith.constant 1 : index
    %c0_83 = arith.constant 0 : index
    %c3_84 = arith.constant 3 : index
    %c0_85 = arith.constant 0 : index
    %c0_86 = arith.constant 0 : index
    %33 = vector.load %arg1[%c0_81, %c1_82, %c0_83, %c3_84, %c0_85, %c0_86] : memref<1x3x8x8x8x8xf32, #tpu.memory_space<vmem>>, vector<1x1x8x1x8x8xf32>
    %34 = vector.shape_cast %33 : vector<1x1x8x1x8x8xf32> to vector<8x8x8xf32>
    %c0_87 = arith.constant 0 : index
    %c0_88 = arith.constant 0 : index
    %c88 = arith.constant 88 : index
    %35 = vector.load %arg6[%c0_87, %c0_88, %c88] : memref<8x8x192xf32, #tpu.memory_space<vmem>>, vector<8x8x8xf32>
    tpu.vector_store %arg6[%c0_87, %c0_88, %c88], %34 {strides = array<i32>} : memref<8x8x192xf32, #tpu.memory_space<vmem>>, vector<8x8x8xf32>,
    %c0_89 = arith.constant 0 : index
    %c1_90 = arith.constant 1 : index
    %c0_91 = arith.constant 0 : index
    %c4_92 = arith.constant 4 : index
    %c0_93 = arith.constant 0 : index
    %c0_94 = arith.constant 0 : index
    %36 = vector.load %arg1[%c0_89, %c1_90, %c0_91, %c4_92, %c0_93, %c0_94] : memref<1x3x8x8x8x8xf32, #tpu.memory_space<vmem>>, vector<1x1x8x1x8x8xf32>
    %37 = vector.shape_cast %36 : vector<1x1x8x1x8x8xf32> to vector<8x8x8xf32>
    %c0_95 = arith.constant 0 : index
    %c0_96 = arith.constant 0 : index
    %c96 = arith.constant 96 : index
    %38 = vector.load %arg6[%c0_95, %c0_96, %c96] : memref<8x8x192xf32, #tpu.memory_space<vmem>>, vector<8x8x8xf32>
    tpu.vector_store %arg6[%c0_95, %c0_96, %c96], %37 {strides = array<i32>} : memref<8x8x192xf32, #tpu.memory_space<vmem>>, vector<8x8x8xf32>,
    %c0_97 = arith.constant 0 : index
    %c1_98 = arith.constant 1 : index
    %c0_99 = arith.constant 0 : index
    %c5_100 = arith.constant 5 : index
    %c0_101 = arith.constant 0 : index
    %c0_102 = arith.constant 0 : index
    %39 = vector.load %arg1[%c0_97, %c1_98, %c0_99, %c5_100, %c0_101, %c0_102] : memref<1x3x8x8x8x8xf32, #tpu.memory_space<vmem>>, vector<1x1x8x1x8x8xf32>
    %40 = vector.shape_cast %39 : vector<1x1x8x1x8x8xf32> to vector<8x8x8xf32>
    %c0_103 = arith.constant 0 : index
    %c0_104 = arith.constant 0 : index
    %c104 = arith.constant 104 : index
    %41 = vector.load %arg6[%c0_103, %c0_104, %c104] : memref<8x8x192xf32, #tpu.memory_space<vmem>>, vector<8x8x8xf32>
    tpu.vector_store %arg6[%c0_103, %c0_104, %c104], %40 {strides = array<i32>} : memref<8x8x192xf32, #tpu.memory_space<vmem>>, vector<8x8x8xf32>,
    %c0_105 = arith.constant 0 : index
    %c1_106 = arith.constant 1 : index
    %c0_107 = arith.constant 0 : index
    %c6_108 = arith.constant 6 : index
    %c0_109 = arith.constant 0 : index
    %c0_110 = arith.constant 0 : index
    %42 = vector.load %arg1[%c0_105, %c1_106, %c0_107, %c6_108, %c0_109, %c0_110] : memref<1x3x8x8x8x8xf32, #tpu.memory_space<vmem>>, vector<1x1x8x1x8x8xf32>
    %43 = vector.shape_cast %42 : vector<1x1x8x1x8x8xf32> to vector<8x8x8xf32>
    %c0_111 = arith.constant 0 : index
    %c0_112 = arith.constant 0 : index
    %c112 = arith.constant 112 : index
    %44 = vector.load %arg6[%c0_111, %c0_112, %c112] : memref<8x8x192xf32, #tpu.memory_space<vmem>>, vector<8x8x8xf32>
    tpu.vector_store %arg6[%c0_111, %c0_112, %c112], %43 {strides = array<i32>} : memref<8x8x192xf32, #tpu.memory_space<vmem>>, vector<8x8x8xf32>,
    %c0_113 = arith.constant 0 : index
    %c1_114 = arith.constant 1 : index
    %c0_115 = arith.constant 0 : index
    %c7_116 = arith.constant 7 : index
    %c0_117 = arith.constant 0 : index
    %c0_118 = arith.constant 0 : index
    %45 = vector.load %arg1[%c0_113, %c1_114, %c0_115, %c7_116, %c0_117, %c0_118] : memref<1x3x8x8x8x8xf32, #tpu.memory_space<vmem>>, vector<1x1x8x1x8x8xf32>
    %46 = vector.shape_cast %45 : vector<1x1x8x1x8x8xf32> to vector<8x8x8xf32>
    %c0_119 = arith.constant 0 : index
    %c0_120 = arith.constant 0 : index
    %c120 = arith.constant 120 : index
    %47 = vector.load %arg6[%c0_119, %c0_120, %c120] : memref<8x8x192xf32, #tpu.memory_space<vmem>>, vector<8x8x8xf32>
    tpu.vector_store %arg6[%c0_119, %c0_120, %c120], %46 {strides = array<i32>} : memref<8x8x192xf32, #tpu.memory_space<vmem>>, vector<8x8x8xf32>,
    %c0_121 = arith.constant 0 : index
    %c2_122 = arith.constant 2 : index
    %c0_123 = arith.constant 0 : index
    %c0_124 = arith.constant 0 : index
    %c0_125 = arith.constant 0 : index
    %c0_126 = arith.constant 0 : index
    %48 = vector.load %arg1[%c0_121, %c2_122, %c0_123, %c0_124, %c0_125, %c0_126] : memref<1x3x8x8x8x8xf32, #tpu.memory_space<vmem>>, vector<1x1x8x1x8x8xf32>
    %49 = vector.shape_cast %48 : vector<1x1x8x1x8x8xf32> to vector<8x8x8xf32>
    %c0_127 = arith.constant 0 : index
    %c0_128 = arith.constant 0 : index
    %c128 = arith.constant 128 : index
    %50 = vector.load %arg6[%c0_127, %c0_128, %c128] : memref<8x8x192xf32, #tpu.memory_space<vmem>>, vector<8x8x8xf32>
    tpu.vector_store %arg6[%c0_127, %c0_128, %c128], %49 {strides = array<i32>} : memref<8x8x192xf32, #tpu.memory_space<vmem>>, vector<8x8x8xf32>,
    %c0_129 = arith.constant 0 : index
    %c2_130 = arith.constant 2 : index
    %c0_131 = arith.constant 0 : index
    %c1_132 = arith.constant 1 : index
    %c0_133 = arith.constant 0 : index
    %c0_134 = arith.constant 0 : index
    %51 = vector.load %arg1[%c0_129, %c2_130, %c0_131, %c1_132, %c0_133, %c0_134] : memref<1x3x8x8x8x8xf32, #tpu.memory_space<vmem>>, vector<1x1x8x1x8x8xf32>
    %52 = vector.shape_cast %51 : vector<1x1x8x1x8x8xf32> to vector<8x8x8xf32>
    %c0_135 = arith.constant 0 : index
    %c0_136 = arith.constant 0 : index
    %c136 = arith.constant 136 : index
    %53 = vector.load %arg6[%c0_135, %c0_136, %c136] : memref<8x8x192xf32, #tpu.memory_space<vmem>>, vector<8x8x8xf32>
    tpu.vector_store %arg6[%c0_135, %c0_136, %c136], %52 {strides = array<i32>} : memref<8x8x192xf32, #tpu.memory_space<vmem>>, vector<8x8x8xf32>,
    %c0_137 = arith.constant 0 : index
    %c2_138 = arith.constant 2 : index
    %c0_139 = arith.constant 0 : index
    %c2_140 = arith.constant 2 : index
    %c0_141 = arith.constant 0 : index
    %c0_142 = arith.constant 0 : index
    %54 = vector.load %arg1[%c0_137, %c2_138, %c0_139, %c2_140, %c0_141, %c0_142] : memref<1x3x8x8x8x8xf32, #tpu.memory_space<vmem>>, vector<1x1x8x1x8x8xf32>
    %55 = vector.shape_cast %54 : vector<1x1x8x1x8x8xf32> to vector<8x8x8xf32>
    %c0_143 = arith.constant 0 : index
    %c0_144 = arith.constant 0 : index
    %c144 = arith.constant 144 : index
    %56 = vector.load %arg6[%c0_143, %c0_144, %c144] : memref<8x8x192xf32, #tpu.memory_space<vmem>>, vector<8x8x8xf32>
    tpu.vector_store %arg6[%c0_143, %c0_144, %c144], %55 {strides = array<i32>} : memref<8x8x192xf32, #tpu.memory_space<vmem>>, vector<8x8x8xf32>,
    %c0_145 = arith.constant 0 : index
    %c2_146 = arith.constant 2 : index
    %c0_147 = arith.constant 0 : index
    %c3_148 = arith.constant 3 : index
    %c0_149 = arith.constant 0 : index
    %c0_150 = arith.constant 0 : index
    %57 = vector.load %arg1[%c0_145, %c2_146, %c0_147, %c3_148, %c0_149, %c0_150] : memref<1x3x8x8x8x8xf32, #tpu.memory_space<vmem>>, vector<1x1x8x1x8x8xf32>
    %58 = vector.shape_cast %57 : vector<1x1x8x1x8x8xf32> to vector<8x8x8xf32>
    %c0_151 = arith.constant 0 : index
    %c0_152 = arith.constant 0 : index
    %c152 = arith.constant 152 : index
    %59 = vector.load %arg6[%c0_151, %c0_152, %c152] : memref<8x8x192xf32, #tpu.memory_space<vmem>>, vector<8x8x8xf32>
    tpu.vector_store %arg6[%c0_151, %c0_152, %c152], %58 {strides = array<i32>} : memref<8x8x192xf32, #tpu.memory_space<vmem>>, vector<8x8x8xf32>,
    %c0_153 = arith.constant 0 : index
    %c2_154 = arith.constant 2 : index
    %c0_155 = arith.constant 0 : index
    %c4_156 = arith.constant 4 : index
    %c0_157 = arith.constant 0 : index
    %c0_158 = arith.constant 0 : index
    %60 = vector.load %arg1[%c0_153, %c2_154, %c0_155, %c4_156, %c0_157, %c0_158] : memref<1x3x8x8x8x8xf32, #tpu.memory_space<vmem>>, vector<1x1x8x1x8x8xf32>
    %61 = vector.shape_cast %60 : vector<1x1x8x1x8x8xf32> to vector<8x8x8xf32>
    %c0_159 = arith.constant 0 : index
    %c0_160 = arith.constant 0 : index
    %c160 = arith.constant 160 : index
    %62 = vector.load %arg6[%c0_159, %c0_160, %c160] : memref<8x8x192xf32, #tpu.memory_space<vmem>>, vector<8x8x8xf32>
    tpu.vector_store %arg6[%c0_159, %c0_160, %c160], %61 {strides = array<i32>} : memref<8x8x192xf32, #tpu.memory_space<vmem>>, vector<8x8x8xf32>,
    %c0_161 = arith.constant 0 : index
    %c2_162 = arith.constant 2 : index
    %c0_163 = arith.constant 0 : index
    %c5_164 = arith.constant 5 : index
    %c0_165 = arith.constant 0 : index
    %c0_166 = arith.constant 0 : index
    %63 = vector.load %arg1[%c0_161, %c2_162, %c0_163, %c5_164, %c0_165, %c0_166] : memref<1x3x8x8x8x8xf32, #tpu.memory_space<vmem>>, vector<1x1x8x1x8x8xf32>
    %64 = vector.shape_cast %63 : vector<1x1x8x1x8x8xf32> to vector<8x8x8xf32>
    %c0_167 = arith.constant 0 : index
    %c0_168 = arith.constant 0 : index
    %c168 = arith.constant 168 : index
    %65 = vector.load %arg6[%c0_167, %c0_168, %c168] : memref<8x8x192xf32, #tpu.memory_space<vmem>>, vector<8x8x8xf32>
    tpu.vector_store %arg6[%c0_167, %c0_168, %c168], %64 {strides = array<i32>} : memref<8x8x192xf32, #tpu.memory_space<vmem>>, vector<8x8x8xf32>,
    %c0_169 = arith.constant 0 : index
    %c2_170 = arith.constant 2 : index
    %c0_171 = arith.constant 0 : index
    %c6_172 = arith.constant 6 : index
    %c0_173 = arith.constant 0 : index
    %c0_174 = arith.constant 0 : index
    %66 = vector.load %arg1[%c0_169, %c2_170, %c0_171, %c6_172, %c0_173, %c0_174] : memref<1x3x8x8x8x8xf32, #tpu.memory_space<vmem>>, vector<1x1x8x1x8x8xf32>
    %67 = vector.shape_cast %66 : vector<1x1x8x1x8x8xf32> to vector<8x8x8xf32>
    %c0_175 = arith.constant 0 : index
    %c0_176 = arith.constant 0 : index
    %c176 = arith.constant 176 : index
    %68 = vector.load %arg6[%c0_175, %c0_176, %c176] : memref<8x8x192xf32, #tpu.memory_space<vmem>>, vector<8x8x8xf32>
    tpu.vector_store %arg6[%c0_175, %c0_176, %c176], %67 {strides = array<i32>} : memref<8x8x192xf32, #tpu.memory_space<vmem>>, vector<8x8x8xf32>,
    %c0_177 = arith.constant 0 : index
    %c2_178 = arith.constant 2 : index
    %c0_179 = arith.constant 0 : index
    %c7_180 = arith.constant 7 : index
    %c0_181 = arith.constant 0 : index
    %c0_182 = arith.constant 0 : index
    %69 = vector.load %arg1[%c0_177, %c2_178, %c0_179, %c7_180, %c0_181, %c0_182] : memref<1x3x8x8x8x8xf32, #tpu.memory_space<vmem>>, vector<1x1x8x1x8x8xf32>
    %70 = vector.shape_cast %69 : vector<1x1x8x1x8x8xf32> to vector<8x8x8xf32>
    %c0_183 = arith.constant 0 : index
    %c0_184 = arith.constant 0 : index
    %c184 = arith.constant 184 : index
    %71 = vector.load %arg6[%c0_183, %c0_184, %c184] : memref<8x8x192xf32, #tpu.memory_space<vmem>>, vector<8x8x8xf32>
    tpu.vector_store %arg6[%c0_183, %c0_184, %c184], %70 {strides = array<i32>} : memref<8x8x192xf32, #tpu.memory_space<vmem>>, vector<8x8x8xf32>,
    %c0_185 = arith.constant 0 : index
    %c0_186 = arith.constant 0 : index
    %c0_187 = arith.constant 0 : index
    %72 = vector.load %arg6[%c0_185, %c0_186, %c0_187] : memref<8x8x192xf32, #tpu.memory_space<vmem>>, vector<8x8x192xf32>
    %73 = vector.shape_cast %72 : vector<8x8x192xf32> to vector<64x192xf32>
    %c0_188 = arith.constant 0 : index
    %c0_189 = arith.constant 0 : index
    %74 = vector.load %arg2[%c0_188, %c0_189] : memref<192x4xf32, #tpu.memory_space<vmem>>, vector<192x4xf32>
    %cst = arith.constant dense<0.000000e+00> : vector<64x4xf32>
    %75 = tpu.matmul %73, %74, %cst {dimension_numbers = #tpu.dot_dimension_numbers<[1], [0], [0], [1], [0, 0, 1, 1], [], []>} : vector<64x192xf32>, vector<192x4xf32>, vector<64x4xf32> -> vector<64x4xf32>
    %c0_190 = arith.constant 0 : index
    %c0_191 = arith.constant 0 : index
    %76 = vector.load %arg3[%c0_190, %c0_191] : memref<64x4xf32, #tpu.memory_space<vmem>>, vector<64x4xf32>
    %77 = arith.addf %75, %76 : vector<64x4xf32>
    %c0_192 = arith.constant 0 : index
    %c0_193 = arith.constant 0 : index
    %78 = vector.load %arg4[%c0_192, %c0_193] : memref<1x4xf32, #tpu.memory_space<vmem>>, vector<1x4xf32>
    %c0_194 = arith.constant 0 : index
    %c0_195 = arith.constant 0 : index
    %c0_196 = arith.constant 0 : index
    %79 = vector.load %arg5[%c0_194, %c0_195, %c0_196] : memref<1x65x4xf32, #tpu.memory_space<vmem>>, vector<1x1x4xf32>
    %80 = vector.shape_cast %79 : vector<1x1x4xf32> to vector<1x4xf32>
    %81 = vector.shape_cast %78 : vector<1x4xf32> to vector<1x1x4xf32>
    tpu.vector_store %arg5[%c0_194, %c0_195, %c0_196], %81 {strides = array<i32>} : memref<1x65x4xf32, #tpu.memory_space<vmem>>, vector<1x1x4xf32>,
    %c0_197 = arith.constant 0 : index
    %c1_198 = arith.constant 1 : index
    %c0_199 = arith.constant 0 : index
    %82 = vector.load %arg5[%c0_197, %c1_198, %c0_199] : memref<1x65x4xf32, #tpu.memory_space<vmem>>, vector<1x64x4xf32>
    %83 = vector.shape_cast %82 : vector<1x64x4xf32> to vector<64x4xf32>
    %84 = vector.shape_cast %77 : vector<64x4xf32> to vector<1x64x4xf32>
    tpu.vector_store %arg5[%c0_197, %c1_198, %c0_199], %84 {strides = array<i32>} : memref<1x65x4xf32, #tpu.memory_space<vmem>>, vector<1x64x4xf32>,
    return
  }
  func.func @transform_0(%arg0: i32) -> (i32, i32, i32, i32, i32, i32) {
    %c0_i32 = arith.constant 0 : i32
    %c0_i32_0 = arith.constant 0 : i32
    %c0_i32_1 = arith.constant 0 : i32
    %c0_i32_2 = arith.constant 0 : i32
    %c0_i32_3 = arith.constant 0 : i32
    %c0_i32_4 = arith.constant 0 : i32
    return %arg0, %c0_i32, %c0_i32_0, %c0_i32_1, %c0_i32_2, %c0_i32_3 : i32, i32, i32, i32, i32, i32
  }
  func.func @transform_1(%arg0: i32) -> (i32, i32) {
    %c0_i32 = arith.constant 0 : i32
    %c0_i32_0 = arith.constant 0 : i32
    %c0_i32_1 = arith.constant 0 : i32
    return %c0_i32, %c0_i32_0 : i32, i32
  }
  func.func @transform_2(%arg0: i32) -> (i32, i32) {
    %c0_i32 = arith.constant 0 : i32
    %c0_i32_0 = arith.constant 0 : i32
    %c0_i32_1 = arith.constant 0 : i32
    return %c0_i32, %c0_i32_0 : i32, i32
  }
  func.func @transform_3(%arg0: i32) -> (i32, i32) {
    %c0_i32 = arith.constant 0 : i32
    %c0_i32_0 = arith.constant 0 : i32
    %c0_i32_1 = arith.constant 0 : i32
    return %c0_i32, %c0_i32_0 : i32, i32
  }
  func.func @transform_4(%arg0: i32) -> (i32, i32, i32) {
    %c0_i32 = arith.constant 0 : i32
    %c0_i32_0 = arith.constant 0 : i32
    %c0_i32_1 = arith.constant 0 : i32
    return %arg0, %c0_i32, %c0_i32_0 : i32, i32, i32
  }
}

</mosaic_0001>

<bundles_post_ra>
// kernel: patch_embedding_forward.1
= control target key start
LH: loop header
LB: loop body
LE: loop exit
PB: predicated region body
PF: predicated region fallthrough
CT: control target
= control target key end

     0   :  { %s1894_s15 = smov 0   ;;  %s2651_s0 = inlined_call_operand.vmem [shape: f32[2,3,8,8,8,8], index: 0, kind: input, shape index: {}]   ;;  %s2652_s1 = inlined_call_operand.vmem [shape: f32[192,4], index: 1, kind: input, shape index: {}]   ;;  %s2653_s2 = inlined_call_operand.vmem [shape: f32[64,4], index: 2, kind: input, shape index: {}]   ;;  %s2654_s3 = inlined_call_operand.vmem [shape: f32[1,4], index: 3, kind: input, shape index: {}]   ;;  %s2655_s4 = inlined_call_operand.vmem [shape: f32[2,65,4], index: 4, kind: output, shape index: {}]  }
   0x1 LB: > { %s1570_s16 = sadd.s32 4294967295, %s1851_s15   ;;  %p1574_p0 = scmp.ge.s32.totalorder %s1851_s15, 1  ;;  %s1851_s15 = sphi %s1894_s15, %s14_s15  }
   0x2   : > { %p162_p1 = scmp.lt.s32.totalorder %s1851_s15, 3 }
   0x4   : > { %p163_p2 = pnand %p1574_p0, %p162_p1 }
   0x5   : > { %p188_p3 = scmp.lt.s32.totalorder (!%p163_p2), %s1570_s16, 1  ;;  %s1853_s21 = smov (!%p163_p2), 8  }
   0x6   : > { %166 = sbr.rel (%p163_p2) target bundleno = 684 (0x2ac), region = 36  ;;  %s1854_s22 = smov (!%p163_p2), 16  }
   0x7   : > { %s1855_s23 = smov (!%p163_p2), 24   ;;  %s1856_s24 = smov (!%p163_p2), 32  }
   0x8   : > { %s1857_s25 = smov (!%p163_p2), 40   ;;  %s1858_s26 = smov (!%p163_p2), 48  }
   0x9   : > { %s1859_s27 = smov (!%p163_p2), 56   ;;  %s1860_s28 = smov (!%p163_p2), 64  }
   0xa   : > { %s1861_s29 = smov (!%p163_p2), 72   ;;  %s1862_s30 = smov (!%p163_p2), 80  }
   0xb   : > { %s2660_s16 = smov (!%p188_p3, %s1570_s16), 1  ;;  %vm206_vm0 = vcmask 64512   ;;  %s1863_s5 = smov 88   ;;  %vm256_vm1 = vcmask 130112   ;;  %vm306_vm2 = vcmask 195712   ;;  %vm356_vm3 = vcmask 261312  }
   0xc   : > { %s1819_s17 = smul.u32 1536, %s2660_s16  ;;  %s1864_s6 = smov 96   ;;  %vm406_vm4 = vcmask 326912   ;;  %vm456_vm5 = vcmask 392512   ;;  %vm506_vm6 = vcmask 458112   ;;  %vm556_vm7 = vcmask 523712  }
   0xd   : > { %s1866_s8 = smov 104   ;;  %s1867_s13 = smov 112   ;;  %vm606_vm8 = vcmask 589312   ;;  %vm656_vm9 = vcmask 654912   ;;  %vm706_vm10 = vcmask 720512   ;;  %vm2656_vm11 = vcmask 786112  }
   0xe   : > { %s1908_s20 = scalar_lea.vmem %s2651_s0, %s1819_s17  ;;  %s1868_s11 = smov 120   ;;  %vm806_vm12 = vcmask 851712   ;;  %vm856_vm13 = vcmask 917312   ;;  %vm906_vm14 = vcmask 982912   ;;  %vm1373_vm15 = vcmask 523264  }
   0xf   : > { %v1579_v0 = vld [vmem:[%s1908_s20 + $0x88] sm:$0xff]  ;;  %v1586_v8 = vld [vmem:[%s1908_s20 + $0x50] sm:$0xff]  ;;  %v200_v12 = vld [vmem:[%s1908_s20 + $0x80] sm:$0xff] }
  0x10   : > { %v1577_v1 = vld [vmem:[%s1908_s20 + $0x8] sm:$0xff]  ;;  %236 = vrot.lane.b32.xlu1 %v1579_v0, %s1853_s21  ;;  %v1585_v9 = vld [vmem:[%s1908_s20 + $0x10] sm:$0xff]  ;;  %v198_v13 = vld [vmem:[%s1908_s20] sm:$0xff]  ;;  %209 = vst.msk [vmem:[#allocation2 + $0x20] sm:$0xff] %vm206_vm0, %v200_v12 }
  0x11   : > { %232 = vrot.lane.b32.xlu0 %v1577_v1, %s1853_s21  ;;  %v1580_v2 = vld [vmem:[%s1908_s20 + $0xc8] sm:$0xff]  ;;  %v1588_v10 = vld [vmem:[%s1908_s20 + $0xd0] sm:$0xff]  ;;  %207 = vst.msk [vmem:[#allocation2] sm:$0xff] %vm206_vm0, %v198_v13  ;;  %v201_v16 = vld [vmem:[%s1908_s20 + $0xc0] sm:$0xff] }
  0x12   : > { %v1578_v3 = vld [vmem:[%s1908_s20 + $0x48] sm:$0xff]  ;;  %v1587_v11 = vld [vmem:[%s1908_s20 + $0x90] sm:$0xff]  ;;  %210 = vst.msk [vmem:[#allocation2 + $0x30] sm:$0xff] %vm206_vm0, %v201_v16  ;;  %v199_v17 = vld [vmem:[%s1908_s20 + $0x40] sm:$0xff] }
  0x13   : > { %v1582_v4 = vld [vmem:[%s1908_s20 + $0x148] sm:$0xff]  ;;  %v1590_v14 = vld [vmem:[%s1908_s20 + $0x150] sm:$0xff]  ;;  %208 = vst.msk [vmem:[#allocation2 + $0x10] sm:$0xff] %vm206_vm0, %v199_v17  ;;  %v203_v18 = vld [vmem:[%s1908_s20 + $0x140] sm:$0xff] }
  0x14   : > { %238 = vrot.lane.b32.xlu1 %v1580_v2, %s1853_s21  ;;  %v1581_v5 = vld [vmem:[%s1908_s20 + $0x108] sm:$0xff]  ;;  %v1589_v15 = vld [vmem:[%s1908_s20 + $0x110] sm:$0xff]  ;;  %v202_v19 = vld [vmem:[%s1908_s20 + $0x100] sm:$0xff]  ;;  %212 = vst.msk [vmem:[#allocation2 + $0x50] sm:$0xff] %vm206_vm0, %v203_v18 }
  0x15   : > { %234 = vrot.lane.b32.xlu0 %v1578_v3, %s1853_s21  ;;  %v1584_v6 = vld [vmem:[%s1908_s20 + $0x1c8] sm:$0xff]  ;;  %211 = vst.msk [vmem:[#allocation2 + $0x40] sm:$0xff] %vm206_vm0, %v202_v19  ;;  %v205_v20 = vld [vmem:[%s1908_s20 + $0x1c0] sm:$0xff]  ;;  %v1592_v21 = vld [vmem:[%s1908_s20 + $0x1d0] sm:$0xff] }
  0x16   : > { %v1583_v7 = vld [vmem:[%s1908_s20 + $0x188] sm:$0xff]  ;;  %v1591_v22 = vld [vmem:[%s1908_s20 + $0x190] sm:$0xff]  ;;  %214 = vst.msk [vmem:[#allocation2 + $0x70] sm:$0xff] %vm206_vm0, %v205_v20  ;;  %v204_v23 = vld [vmem:[%s1908_s20 + $0x180] sm:$0xff] }
  0x17   : > { %213 = vst.msk [vmem:[#allocation2 + $0x60] sm:$0xff] %vm206_vm0, %v204_v23  ;;  %v1594_v24 = vld [vmem:[%s1908_s20 + $0x58] sm:$0xff]  ;;  %v1602_v32 = vld [vmem:[%s1908_s20 + $0x60] sm:$0xff]  ;;  %v1610_v40 = vld [vmem:[%s1908_s20 + $0x68] sm:$0xff] }
  0x18   : > { %242 = vrot.lane.b32.xlu1 %v1582_v4, %s1853_s21  ;;  %v1593_v25 = vld [vmem:[%s1908_s20 + $0x18] sm:$0xff]  ;;  %v1601_v33 = vld [vmem:[%s1908_s20 + $0x20] sm:$0xff]  ;;  %v1609_v41 = vld [vmem:[%s1908_s20 + $0x28] sm:$0xff] }
  0x19   : > { %240 = vrot.lane.b32.xlu0 %v1581_v5, %s1853_s21  ;;  %v1596_v26 = vld [vmem:[%s1908_s20 + $0xd8] sm:$0xff]  ;;  %v1604_v34 = vld [vmem:[%s1908_s20 + $0xe0] sm:$0xff]  ;;  %v1613_v42 = vld [vmem:[%s1908_s20 + $0x128] sm:$0xff] }
  0x1a   : > { %v1595_v27 = vld [vmem:[%s1908_s20 + $0x98] sm:$0xff]  ;;  %v1603_v35 = vld [vmem:[%s1908_s20 + $0xa0] sm:$0xff]  ;;  %v1611_v43 = vld [vmem:[%s1908_s20 + $0xa8] sm:$0xff] }
  0x1b   : > { %v1598_v28 = vld [vmem:[%s1908_s20 + $0x158] sm:$0xff]  ;;  %v1606_v36 = vld [vmem:[%s1908_s20 + $0x160] sm:$0xff]  ;;  %v1621_v45 = vld [vmem:[%s1908_s20 + $0x130] sm:$0xff] }
  0x1c   : > { %246 = vrot.lane.b32.xlu1 %v1584_v6, %s1853_s21  ;;  %v1597_v29 = vld [vmem:[%s1908_s20 + $0x118] sm:$0xff]  ;;  %v1605_v37 = vld [vmem:[%s1908_s20 + $0x120] sm:$0xff]  ;;  %v1617_v46 = vld [vmem:[%s1908_s20 + $0x30] sm:$0xff] }
  0x1d   : > { %244 = vrot.lane.b32.xlu0 %v1583_v7, %s1853_s21  ;;  %v1600_v30 = vld [vmem:[%s1908_s20 + $0x1d8] sm:$0xff]  ;;  %v1608_v38 = vld [vmem:[%s1908_s20 + $0x1e0] sm:$0xff]  ;;  %v1709_v52 = vld [vmem:[%s1908_s20 + $0x508] sm:$0xff] }
  0x1e   : > { %v1599_v31 = vld [vmem:[%s1908_s20 + $0x198] sm:$0xff]  ;;  %v1607_v39 = vld [vmem:[%s1908_s20 + $0x1a0] sm:$0xff]  ;;  %v1705_v53 = vld [vmem:[%s1908_s20 + $0x408] sm:$0xff] }
  0x1f   : > { %v1701_v44 = vld [vmem:[%s1908_s20 + $0x500] sm:$0xff]  ;;  %v1629_v48 = vld [vmem:[%s1908_s20 + $0x138] sm:$0xff]  ;;  %v1641_v54 = vld [vmem:[%s1908_s20 + $0x208] sm:$0xff] }
  0x20   : > { %284 = vrot.lane.b32.xlu1 %v1586_v8, %s1854_s22  ;;  %978 = vst.msk [vmem:[#allocation2 + $0x48] sm:$0xff] %vm206_vm0, %v1701_v44  ;;  %v1697_v47 = vld [vmem:[%s1908_s20 + $0x400] sm:$0xff]  ;;  %v1625_v49 = vld [vmem:[%s1908_s20 + $0x38] sm:$0xff]  ;;  %v1614_v55 = vld [vmem:[%s1908_s20 + $0x168] sm:$0xff] }
  0x21   : > { %282 = vrot.lane.b32.xlu0 %v1585_v9, %s1854_s22  ;;  %974 = vst.msk [vmem:[#allocation2 + $0x8] sm:$0xff] %vm206_vm0, %v1697_v47  ;;  %v1637_v50 = vld [vmem:[%s1908_s20 + $0x300] sm:$0xff]  ;;  %v1713_v56 = vld [vmem:[%s1908_s20 + $0x410] sm:$0xff]  ;;  %v1645_v57 = vld [vmem:[%s1908_s20 + $0x308] sm:$0xff] }
  0x22   : > { %v1633_v51 = vld [vmem:[%s1908_s20 + $0x200] sm:$0xff]  ;;  %v1618_v58 = vld [vmem:[%s1908_s20 + $0x70] sm:$0xff]  ;;  %v1721_v62 = vld [vmem:[%s1908_s20 + $0x418] sm:$0xff] }
  0x23   : > { %v1717_v59 = vld [vmem:[%s1908_s20 + $0x510] sm:$0xff]  ;;  %v1626_v0 = vld [vmem:[%s1908_s20 + $0x78] sm:$0xff]  ;;  %v1698_v4 = vld [vmem:[%s1908_s20 + $0x440] sm:$0xff] }
  0x24   : > { %288 = vrot.lane.b32.xlu1 %v1588_v10, %s1854_s22  ;;  %v1649_v60 = vld [vmem:[%s1908_s20 + $0x210] sm:$0xff]  ;;  %v1725_v1 = vld [vmem:[%s1908_s20 + $0x518] sm:$0xff]  ;;  %v1729_v5 = vld [vmem:[%s1908_s20 + $0x420] sm:$0xff]  ;;  %975 = vst.msk [vmem:[#allocation2 + $0x18] sm:$0xff] %vm206_vm0, %v1698_v4 }
  0x25   : > { %286 = vrot.lane.b32.xlu0 %v1587_v11, %s1854_s22  ;;  %v1622_v61 = vld [vmem:[%s1908_s20 + $0x170] sm:$0xff]  ;;  %v1657_v2 = vld [vmem:[%s1908_s20 + $0x218] sm:$0xff]  ;;  %v1634_v9 = vld [vmem:[%s1908_s20 + $0x240] sm:$0xff] }
  0x26   : > { %v1653_v63 = vld [vmem:[%s1908_s20 + $0x310] sm:$0xff]  ;;  %v1630_v3 = vld [vmem:[%s1908_s20 + $0x178] sm:$0xff]  ;;  %v1733_v10 = vld [vmem:[%s1908_s20 + $0x520] sm:$0xff] }
  0x27   : > { %v1661_v6 = vld [vmem:[%s1908_s20 + $0x318] sm:$0xff]  ;;  %v1702_v11 = vld [vmem:[%s1908_s20 + $0x540] sm:$0xff]  ;;  %v1706_v18 = vld [vmem:[%s1908_s20 + $0x448] sm:$0xff] }
  0x28   : > { %292 = vrot.lane.b32.xlu1 %v1590_v14, %s1854_s22  ;;  %979 = vst.msk [vmem:[#allocation2 + $0x58] sm:$0xff] %vm206_vm0, %v1702_v11  ;;  %v1665_v14 = vld [vmem:[%s1908_s20 + $0x220] sm:$0xff]  ;;  %v1710_v23 = vld [vmem:[%s1908_s20 + $0x548] sm:$0xff]  ;;  %v1351_v44 = vld [vmem:[%s2652_s1 + $0x50] sm:$0xff] }
  0x29   : > { %290 = vrot.lane.b32.xlu0 %v1589_v15, %s1854_s22  ;;  %v1638_v15 = vld [vmem:[%s1908_s20 + $0x340] sm:$0xff]  ;;  %v1681_v4 = vld [vmem:[%s1908_s20 + $0x230] sm:$0xff] }
  0x2a   : > { %v1669_v19 = vld [vmem:[%s1908_s20 + $0x320] sm:$0xff] }
  0x2c   : > { %296 = vrot.lane.b32.xlu1 %v1592_v21, %s1854_s22 }
  0x2d   : > { %294 = vrot.lane.b32.xlu0 %v1591_v22, %s1854_s22  ;;  %v1737_v22 = vld [vmem:[%s1908_s20 + $0x428] sm:$0xff] }
  0x30   : > { %334 = vrot.lane.b32.xlu1 %v1594_v24, %s1855_s23 }
  0x31   : > { %332 = vrot.lane.b32.xlu0 %v1593_v25, %s1855_s23 }
  0x34   : > { %338 = vrot.lane.b32.xlu1 %v1596_v26, %s1855_s23  ;;  %v1865_v26 = vmov 0.0  }
  0x35   : > { %336 = vrot.lane.b32.xlu0 %v1595_v27, %s1855_s23  ;;  %1398 = vmatprep.subr.mxu0 %v1865_v26  ;;  %v1356_v27 = vld [vmem:[%s2652_s1 + $0x78] sm:$0xff] }
  0x36   : > { %1771 = vmatprep.subr.mxu1 %v1865_v26  ;;  %1399 = vmatpush1.msra.mxu0 %v1356_v27 }
  0x37   : > { %1795 = vmatpush1.msra.mxu1 %v1356_v27  ;;  %1400 = vmatprep.subr.mxu0 %v1865_v26  ;;  %v1658_v27 = vld [vmem:[%s1908_s20 + $0x258] sm:$0xff] }
  0x38   : > { %342 = vrot.lane.b32.xlu1 %v1598_v28, %s1855_s23  ;;  %v1355_v28 = vld [vmem:[%s2652_s1 + $0x70] sm:$0xff]  ;;  %1772 = vmatprep.subr.mxu1 %v1865_v26 }
  0x39   : > { %340 = vrot.lane.b32.xlu0 %v1597_v29, %s1855_s23  ;;  %v1615_v29 = vld [vmem:[%s1908_s20 + $0x1a8] sm:$0xff]  ;;  %1401 = vmatpush1.msra.mxu0 %v1355_v28 }
  0x3a   : > { %1796 = vmatpush1.msra.mxu1 %v1355_v28  ;;  %1402 = vmatprep.subr.mxu0 %v1865_v26 }
  0x3b   : > { %1773 = vmatprep.subr.mxu1 %v1865_v26 }
  0x3c   : > { %346 = vrot.lane.b32.xlu1 %v1600_v30, %s1855_s23  ;;  %v1741_v30 = vld [vmem:[%s1908_s20 + $0x528] sm:$0xff] }
  0x3d   : > { %344 = vrot.lane.b32.xlu0 %v1599_v31, %s1855_s23 }
  0x40   : > { %384 = vrot.lane.b32.xlu1 %v1602_v32, %s1856_s24 }
  0x41   : > { %382 = vrot.lane.b32.xlu0 %v1601_v33, %s1856_s24  ;;  %v1354_v33 = vld [vmem:[%s2652_s1 + $0x68] sm:$0xff] }
  0x42   : > { %1403 = vmatpush1.msra.mxu0 %v1354_v33  ;;  %1797 = vmatpush1.msra.mxu1 %v1354_v33  ;;  %v1689_v33 = vld [vmem:[%s1908_s20 + $0x238] sm:$0xff] }
  0x43   : > { %1404 = vmatprep.subr.mxu0 %v1865_v26  ;;  %1774 = vmatprep.subr.mxu1 %v1865_v26 }
  0x44   : > { %388 = vrot.lane.b32.xlu1 %v1604_v34, %s1856_s24  ;;  %v1646_v34 = vld [vmem:[%s1908_s20 + $0x348] sm:$0xff] }
  0x45   : > { %386 = vrot.lane.b32.xlu0 %v1603_v35, %s1856_s24  ;;  %v1642_v35 = vld [vmem:[%s1908_s20 + $0x248] sm:$0xff] }
  0x48   : > { %392 = vrot.lane.b32.xlu1 %v1606_v36, %s1856_s24 }
  0x49   : > { %390 = vrot.lane.b32.xlu0 %v1605_v37, %s1856_s24 }
  0x4c   : > { %396 = vrot.lane.b32.xlu1 %v1608_v38, %s1856_s24  ;;  %v1353_v38 = vld [vmem:[%s2652_s1 + $0x60] sm:$0xff] }
  0x4d   : > { %394 = vrot.lane.b32.xlu0 %v1607_v39, %s1856_s24  ;;  %v1352_v39 = vld [vmem:[%s2652_s1 + $0x58] sm:$0xff]  ;;  %1405 = vmatpush1.msra.mxu0 %v1353_v38 }
  0x4e   : > { %1798 = vmatpush1.msra.mxu1 %v1353_v38  ;;  %1406 = vmatprep.subr.mxu0 %v1865_v26  ;;  %v1734_v38 = vld [vmem:[%s1908_s20 + $0x560] sm:$0xff] }
  0x4f   : > { %1775 = vmatprep.subr.mxu1 %v1865_v26  ;;  %1407 = vmatpush1.msra.mxu0 %v1352_v39 }
  0x50   : > { %434 = vrot.lane.b32.xlu1 %v1610_v40, %s1857_s25  ;;  %v1677_v40 = vld [vmem:[%s1908_s20 + $0x328] sm:$0xff]  ;;  %1799 = vmatpush1.msra.mxu1 %v1352_v39  ;;  %v1730_v39 = vld [vmem:[%s1908_s20 + $0x460] sm:$0xff] }
  0x51   : > { %432 = vrot.lane.b32.xlu0 %v1609_v41, %s1857_s25  ;;  %v1673_v41 = vld [vmem:[%s1908_s20 + $0x228] sm:$0xff]  ;;  %1408 = vmatprep.subr.mxu0 %v1865_v26 }
  0x52   : > { %1776 = vmatprep.subr.mxu1 %v1865_v26  ;;  %1409 = vmatpush1.msra.mxu0 %v1351_v44 }
  0x53   : > { %1800 = vmatpush1.msra.mxu1 %v1351_v44  ;;  %1410 = vmatprep.subr.mxu0 %v1865_v26  ;;  %v1358_v44 = vld [vmem:[%s2652_s1 + $0x88] sm:$0xff] }
  0x54   : > { %440 = vrot.lane.b32.xlu1 %v1613_v42, %s1857_s25  ;;  %1777 = vmatprep.subr.mxu1 %v1865_v26 }
  0x55   : > { %436 = vrot.lane.b32.xlu0 %v1611_v43, %s1857_s25 }
  0x58   : > { %490 = vrot.lane.b32.xlu1 %v1621_v45, %s1858_s26  ;;  %v1718_v45 = vld [vmem:[%s1908_s20 + $0x550] sm:$0xff] }
  0x59   : > { %482 = vrot.lane.b32.xlu0 %v1617_v46, %s1858_s26  ;;  %v1714_v46 = vld [vmem:[%s1908_s20 + $0x450] sm:$0xff] }
  0x5c   : > { %540 = vrot.lane.b32.xlu1 %v1629_v48, %s1859_s27 }
  0x5d   : > { %532 = vrot.lane.b32.xlu0 %v1625_v49, %s1859_s27  ;;  %v1350_v49 = vld [vmem:[%s2652_s1 + $0x48] sm:$0xff] }
  0x5e   : > { %1411 = vmatpush1.msra.mxu0 %v1350_v49  ;;  %1801 = vmatpush1.msra.mxu1 %v1350_v49  ;;  %v1357_v49 = vld [vmem:[%s2652_s1 + $0x80] sm:$0xff] }
  0x5f   : > { %1412 = vmatprep.subr.mxu0 %v1865_v26  ;;  %1778 = vmatprep.subr.mxu1 %v1865_v26 }
  0x60   : > { %590 = vrot.lane.b32.xlu1 %v1637_v50, %s1860_s28  ;;  %v1349_v50 = vld [vmem:[%s2652_s1 + $0x40] sm:$0xff] }
  0x61   : > { %582 = vrot.lane.b32.xlu0 %v1633_v51, %s1860_s28  ;;  %v1749_v51 = vld [vmem:[%s1908_s20 + $0x530] sm:$0xff]  ;;  %1413 = vmatpush1.msra.mxu0 %v1349_v50 }
  0x62   : > { %1802 = vmatpush1.msra.mxu1 %v1349_v50  ;;  %1414 = vmatprep.subr.mxu0 %v1865_v26  ;;  %v1670_v50 = vld [vmem:[%s1908_s20 + $0x360] sm:$0xff] }
  0x63   : > { %1779 = vmatprep.subr.mxu1 %v1865_v26 }
  0x64   : > { %1007 = vrot.lane.b32.xlu1 %v1709_v52, %s1853_s21  ;;  %v1745_v52 = vld [vmem:[%s1908_s20 + $0x430] sm:$0xff] }
  0x65   : > { %999 = vrot.lane.b32.xlu0 %v1705_v53, %s1853_s21 }
  0x68   : > { %632 = vrot.lane.b32.xlu1 %v1641_v54, %s1861_s29 }
  0x69   : > { %442 = vrot.lane.b32.xlu0 %v1614_v55, %s1857_s25  ;;  %v1348_v55 = vld [vmem:[%s2652_s1 + $0x38] sm:$0xff] }
  0x6a   : > { %1415 = vmatpush1.msra.mxu0 %v1348_v55  ;;  %1803 = vmatpush1.msra.mxu1 %v1348_v55  ;;  %v1707_v55 = vld [vmem:[%s1908_s20 + $0x488] sm:$0xff] }
  0x6b   : > { %1416 = vmatprep.subr.mxu0 %v1865_v26  ;;  %1780 = vmatprep.subr.mxu1 %v1865_v26 }
  0x6c   : > { %1048 = vrot.lane.b32.xlu1 %v1713_v56, %s1854_s22  ;;  %v1623_v56 = vld [vmem:[%s1908_s20 + $0x1b0] sm:$0xff] }
  0x6d   : > { %640 = vrot.lane.b32.xlu0 %v1645_v57, %s1861_s29  ;;  %v1619_v57 = vld [vmem:[%s1908_s20 + $0xb0] sm:$0xff] }
  0x70   : > { %484 = vrot.lane.b32.xlu1 %v1618_v58, %s1858_s26 }
  0x71   : > { %1056 = vrot.lane.b32.xlu0 %v1717_v59, %s1854_s22 }
  0x74   : > { %682 = vrot.lane.b32.xlu1 %v1649_v60, %s1862_s30  ;;  %v1347_v60 = vld [vmem:[%s2652_s1 + $0x30] sm:$0xff] }
  0x75   : > { %492 = vrot.lane.b32.xlu0 %v1622_v61, %s1858_s26  ;;  %v1346_v61 = vld [vmem:[%s2652_s1 + $0x28] sm:$0xff]  ;;  %1417 = vmatpush1.msra.mxu0 %v1347_v60 }
  0x76   : > { %1804 = vmatpush1.msra.mxu1 %v1347_v60  ;;  %1418 = vmatprep.subr.mxu0 %v1865_v26 }
  0x77   : > { %1781 = vmatprep.subr.mxu1 %v1865_v26  ;;  %1419 = vmatpush1.msra.mxu0 %v1346_v61 }
  0x78   : > { %1097 = vrot.lane.b32.xlu1 %v1721_v62, %s1855_s23  ;;  %v1654_v62 = vld [vmem:[%s1908_s20 + $0x350] sm:$0xff]  ;;  %1805 = vmatpush1.msra.mxu1 %v1346_v61  ;;  %v1616_v61 = vld [vmem:[%s1908_s20 + $0x1e8] sm:$0xff] }
  0x79   : > { %690 = vrot.lane.b32.xlu0 %v1653_v63, %s1862_s30  ;;  %v1650_v63 = vld [vmem:[%s1908_s20 + $0x250] sm:$0xff]  ;;  %1420 = vmatprep.subr.mxu0 %v1865_v26 }
  0x7a   : > { %1782 = vmatprep.subr.mxu1 %v1865_v26 }
  0x7c   : > { %534 = vrot.lane.b32.xlu1 %v1626_v0, %s1859_s27 }
  0x7d   : > { %1105 = vrot.lane.b32.xlu0 %v1725_v1, %s1855_s23 }
  0x80   : > { %732 = vrot.lane.b32.xlu1 %v1657_v2, %s1863_s5  ;;  %v1345_v2 = vld [vmem:[%s2652_s1 + $0x20] sm:$0xff] }
  0x81   : > { %542 = vrot.lane.b32.xlu0 %v1630_v3, %s1859_s27  ;;  %v1685_v3 = vld [vmem:[%s1908_s20 + $0x330] sm:$0xff]  ;;  %1421 = vmatpush1.msra.mxu0 %v1345_v2 }
  0x82   : > { %v237_v7 = vpop.permute.xlu1 %236  ;;  %1806 = vmatpush1.msra.mxu1 %v1345_v2  ;;  %1422 = vmatprep.subr.mxu0 %v1865_v26  ;;  %v1643_v2 = vld [vmem:[%s1908_s20 + $0x288] sm:$0xff] }
  0x83   : > { %v233_v8 = vpop.permute.xlu0 %232  ;;  %259 = vst.msk [vmem:[#allocation2 + $0x20] sm:$0xff] %vm256_vm1, %v237_v7  ;;  %v1344_v7 = vld [vmem:[%s2652_s1 + $0x18] sm:$0xff]  ;;  %1783 = vmatprep.subr.mxu1 %v1865_v26 }
  0x84   : > { %257 = vst.msk [vmem:[#allocation2] sm:$0xff] %vm256_vm1, %v233_v8  ;;  %1146 = vrot.lane.b32.xlu1 %v1729_v5, %s1856_s24  ;;  %v1343_v8 = vld [vmem:[%s2652_s1 + $0x10] sm:$0xff]  ;;  %1423 = vmatpush1.msra.mxu0 %v1344_v7 }
  0x85   : > { %740 = vrot.lane.b32.xlu0 %v1661_v6, %s1863_s5  ;;  %1807 = vmatpush1.msra.mxu1 %v1344_v7 }
  0x86   : > { %v239_v12 = vpop.permute.xlu1 %238  ;;  %1424 = vmatprep.subr.mxu0 %v1865_v26  ;;  %1784 = vmatprep.subr.mxu1 %v1865_v26 }
  0x87   : > { %v235_v13 = vpop.permute.xlu0 %234  ;;  %260 = vst.msk [vmem:[#allocation2 + $0x30] sm:$0xff] %vm256_vm1, %v239_v12  ;;  %1425 = vmatpush1.msra.mxu0 %v1343_v8  ;;  %1808 = vmatpush1.msra.mxu1 %v1343_v8 }
  0x88   : > { %258 = vst.msk [vmem:[#allocation2 + $0x10] sm:$0xff] %vm256_vm1, %v235_v13  ;;  %584 = vrot.lane.b32.xlu1 %v1634_v9, %s1860_s28  ;;  %v1726_v9 = vld [vmem:[%s1908_s20 + $0x558] sm:$0xff]  ;;  %v1342_v13 = vld [vmem:[%s2652_s1 + $0x8] sm:$0xff]  ;;  %1426 = vmatprep.subr.mxu0 %v1865_v26 }
  0x89   : > { %1154 = vrot.lane.b32.xlu0 %v1733_v10, %s1856_s24  ;;  %v1722_v10 = vld [vmem:[%s1908_s20 + $0x458] sm:$0xff]  ;;  %1785 = vmatprep.subr.mxu1 %v1865_v26 }
  0x8a   : > { %v243_v16 = vpop.permute.xlu1 %242  ;;  %1427 = vmatpush1.msra.mxu0 %v1342_v13  ;;  %1809 = vmatpush1.msra.mxu1 %v1342_v13  ;;  %v1750_v13 = vld [vmem:[%s1908_s20 + $0x570] sm:$0xff] }
  0x8b   : > { %v241_v17 = vpop.permute.xlu0 %240  ;;  %262 = vst.msk [vmem:[#allocation2 + $0x50] sm:$0xff] %vm256_vm1, %v243_v16  ;;  %1428 = vmatprep.subr.mxu0 %v1865_v26  ;;  %1786 = vmatprep.subr.mxu1 %v1865_v26 }
  0x8c   : > { %261 = vst.msk [vmem:[#allocation2 + $0x40] sm:$0xff] %vm256_vm1, %v241_v17  ;;  %782 = vrot.lane.b32.xlu1 %v1665_v14, %s1864_s6  ;;  %v1757_v14 = vld [vmem:[%s1908_s20 + $0x538] sm:$0xff] }
  0x8d   : > { %592 = vrot.lane.b32.xlu0 %v1638_v15, %s1860_s28  ;;  %v1753_v15 = vld [vmem:[%s1908_s20 + $0x438] sm:$0xff] }
  0x8e   : > { %v247_v20 = vpop.permute.xlu1 %246 }
  0x8f   : > { %v245_v21 = vpop.permute.xlu0 %244  ;;  %264 = vst.msk [vmem:[#allocation2 + $0x70] sm:$0xff] %vm256_vm1, %v247_v20  ;;  %v1631_v20 = vld [vmem:[%s1908_s20 + $0x1b8] sm:$0xff] }
  0x90   : > { %263 = vst.msk [vmem:[#allocation2 + $0x60] sm:$0xff] %vm256_vm1, %v245_v21  ;;  %1001 = vrot.lane.b32.xlu1 %v1706_v18, %s1853_s21  ;;  %v1341_v18 = vld [vmem:[%s2652_s1] sm:$0xff]  ;;  %v1627_v21 = vld [vmem:[%s1908_s20 + $0xb8] sm:$0xff] }
  0x91   : > { %790 = vrot.lane.b32.xlu0 %v1669_v19, %s1864_s6  ;;  %v1364_v19 = vld [vmem:[%s2652_s1 + $0xb8] sm:$0xff]  ;;  %1429 = vmatpush1.msra.mxu0 %v1341_v18 }
  0x92   : > { %v285_v24 = vpop.permute.xlu1 %284  ;;  %1810 = vmatpush1.msra.mxu1 %v1341_v18  ;;  %1446 = vmatprep.subr.mxu0 %v1865_v26  ;;  %v1620_v18 = vld [vmem:[%s1908_s20 + $0xf0] sm:$0xff] }
  0x93   : > { %v283_v25 = vpop.permute.xlu0 %282  ;;  %308 = vst.msk [vmem:[#allocation2 + $0x10] sm:$0xff] %vm306_vm2, %v285_v24  ;;  %1787 = vmatprep.subr.mxu1 %v1865_v26  ;;  %1447 = vmatpush2.msra.mxu0 %v1364_v19  ;;  %v1363_v24 = vld [vmem:[%s2652_s1 + $0xb0] sm:$0xff] }
  0x94   : > { %307 = vst.msk [vmem:[#allocation2] sm:$0xff] %vm306_vm2, %v283_v25  ;;  %1195 = vrot.lane.b32.xlu1 %v1737_v22, %s1857_s25  ;;  %1811 = vmatpush2.msra.mxu1 %v1364_v19  ;;  %v1662_v25 = vld [vmem:[%s1908_s20 + $0x358] sm:$0xff] }
  0x95   : > { %1009 = vrot.lane.b32.xlu0 %v1710_v23, %s1853_s21  ;;  %1448 = vmatprep.subr.mxu0 %v1865_v26 }
  0x96   : > { %v289_v31 = vpop.permute.xlu1 %288  ;;  %1788 = vmatprep.subr.mxu1 %v1865_v26  ;;  %1449 = vmatpush2.msra.mxu0 %v1363_v24 }
  0x97   : > { %v287_v32 = vpop.permute.xlu0 %286  ;;  %310 = vst.msk [vmem:[#allocation2 + $0x30] sm:$0xff] %vm306_vm2, %v289_v31  ;;  %1812 = vmatpush2.msra.mxu1 %v1363_v24  ;;  %1450 = vmatprep.subr.mxu0 %v1865_v26  ;;  %v1361_v31 = vld [vmem:[%s2652_s1 + $0xa0] sm:$0xff] }
  0x98   : > { %309 = vst.msk [vmem:[#allocation2 + $0x20] sm:$0xff] %vm306_vm2, %v287_v32  ;;  %444 = vrot.lane.b32.xlu1 %v1615_v29, %s1857_s25  ;;  %1789 = vmatprep.subr.mxu1 %v1865_v26  ;;  %v1693_v32 = vld [vmem:[%s1908_s20 + $0x338] sm:$0xff] }
  0x99   : > { %1203 = vrot.lane.b32.xlu0 %v1741_v30, %s1857_s25  ;;  %v1362_v30 = vld [vmem:[%s2652_s1 + $0xa8] sm:$0xff] }
  0x9a   : > { %v293_v36 = vpop.permute.xlu1 %292  ;;  %1451 = vmatpush2.msra.mxu0 %v1362_v30  ;;  %1813 = vmatpush2.msra.mxu1 %v1362_v30  ;;  %v1727_v30 = vld [vmem:[%s1908_s20 + $0x598] sm:$0xff] }
  0x9b   : > { %v291_v37 = vpop.permute.xlu0 %290  ;;  %312 = vst.msk [vmem:[#allocation2 + $0x50] sm:$0xff] %vm306_vm2, %v293_v36  ;;  %1452 = vmatprep.subr.mxu0 %v1865_v26  ;;  %1790 = vmatprep.subr.mxu1 %v1865_v26  ;;  %v1360_v36 = vld [vmem:[%s2652_s1 + $0x98] sm:$0xff] }
  0x9c   : > { %311 = vst.msk [vmem:[#allocation2 + $0x40] sm:$0xff] %vm306_vm2, %v291_v37  ;;  %642 = vrot.lane.b32.xlu1 %v1646_v34, %s1861_s29  ;;  %1453 = vmatpush2.msra.mxu0 %v1361_v31  ;;  %v1703_v37 = vld [vmem:[%s1908_s20 + $0x580] sm:$0xff] }
  0x9d   : > { %634 = vrot.lane.b32.xlu0 %v1642_v35, %s1861_s29  ;;  %1814 = vmatpush2.msra.mxu1 %v1361_v31  ;;  %980 = vst.msk [vmem:[#allocation2 + $0x68] sm:$0xff] %vm206_vm0, %v1703_v37  ;;  %v1723_v31 = vld [vmem:[%s1908_s20 + $0x498] sm:$0xff] }
  0x9e   : > { %v297_v42 = vpop.permute.xlu1 %296  ;;  %1454 = vmatprep.subr.mxu0 %v1865_v26  ;;  %1791 = vmatprep.subr.mxu1 %v1865_v26 }
  0x9f   : > { %v295_v43 = vpop.permute.xlu0 %294  ;;  %314 = vst.msk [vmem:[#allocation2 + $0x70] sm:$0xff] %vm306_vm2, %v297_v42  ;;  %1455 = vmatpush2.msra.mxu0 %v1360_v36  ;;  %1815 = vmatpush2.msra.mxu1 %v1360_v36 }
  0xa0   : > { %313 = vst.msk [vmem:[#allocation2 + $0x60] sm:$0xff] %vm306_vm2, %v295_v43  ;;  %840 = vrot.lane.b32.xlu1 %v1677_v40, %s1866_s8  ;;  %v1699_v40 = vld [vmem:[%s1908_s20 + $0x480] sm:$0xff]  ;;  %v1359_v43 = vld [vmem:[%s2652_s1 + $0x90] sm:$0xff]  ;;  %1456 = vmatprep.subr.mxu0 %v1865_v26 }
  0xa1   : > { %832 = vrot.lane.b32.xlu0 %v1673_v41, %s1866_s8  ;;  %976 = vst.msk [vmem:[#allocation2 + $0x28] sm:$0xff] %vm206_vm0, %v1699_v40  ;;  %1792 = vmatprep.subr.mxu1 %v1865_v26 }
  0xa2   : > { %v335_v47 = vpop.permute.xlu1 %334  ;;  %1457 = vmatpush2.msra.mxu0 %v1359_v43  ;;  %1816 = vmatpush2.msra.mxu1 %v1359_v43  ;;  %v1659_v43 = vld [vmem:[%s1908_s20 + $0x298] sm:$0xff] }
  0xa3   : > { %v333_v48 = vpop.permute.xlu0 %332  ;;  %358 = vst.msk [vmem:[#allocation2 + $0x10] sm:$0xff] %vm356_vm3, %v335_v47  ;;  %1458 = vmatprep.subr.mxu0 %v1865_v26  ;;  %1793 = vmatprep.subr.mxu1 %v1865_v26 }
  0xa4   : > { %357 = vst.msk [vmem:[#allocation2] sm:$0xff] %vm356_vm3, %v333_v48  ;;  %1058 = vrot.lane.b32.xlu1 %v1718_v45, %s1854_s22  ;;  %v1639_v45 = vld [vmem:[%s1908_s20 + $0x380] sm:$0xff]  ;;  %1459 = vmatpush2.msra.mxu0 %v1358_v44 }
  0xa5   : > { %1050 = vrot.lane.b32.xlu0 %v1714_v46, %s1854_s22  ;;  %v1635_v46 = vld [vmem:[%s1908_s20 + $0x280] sm:$0xff]  ;;  %1817 = vmatpush2.msra.mxu1 %v1358_v44 }
  0xa6   : > { %v339_v53 = vpop.permute.xlu1 %338  ;;  %1460 = vmatprep.subr.mxu0 %v1865_v26  ;;  %1794 = vmatprep.subr.mxu1 %v1865_v26 }
  0xa7   : > { %v337_v54 = vpop.permute.xlu0 %336  ;;  %360 = vst.msk [vmem:[#allocation2 + $0x30] sm:$0xff] %vm356_vm3, %v339_v53  ;;  %1461 = vmatpush2.msra.mxu0 %v1357_v49  ;;  %1818 = vmatpush2.msra.mxu1 %v1357_v49 }
  0xa8   : > { %359 = vst.msk [vmem:[#allocation2 + $0x20] sm:$0xff] %vm356_vm3, %v337_v54  ;;  %1252 = vrot.lane.b32.xlu1 %v1749_v51, %s1858_s26  ;;  %v1666_v51 = vld [vmem:[%s1908_s20 + $0x260] sm:$0xff]  ;;  %v1711_v54 = vld [vmem:[%s1908_s20 + $0x588] sm:$0xff] }
  0xa9   : > { %1244 = vrot.lane.b32.xlu0 %v1745_v52, %s1858_s26 }
  0xaa   : > { %v343_v58 = vpop.permute.xlu1 %342 }
  0xab   : > { %v341_v59 = vpop.permute.xlu0 %340  ;;  %362 = vst.msk [vmem:[#allocation2 + $0x50] sm:$0xff] %vm356_vm3, %v343_v58  ;;  %v1738_v58 = vld [vmem:[%s1908_s20 + $0x468] sm:$0xff] }
  0xac   : > { %361 = vst.msk [vmem:[#allocation2 + $0x40] sm:$0xff] %vm356_vm3, %v341_v59  ;;  %494 = vrot.lane.b32.xlu1 %v1623_v56, %s1858_s26 }
  0xad   : > { %486 = vrot.lane.b32.xlu0 %v1619_v57, %s1858_s26  ;;  %v1742_v57 = vld [vmem:[%s1908_s20 + $0x568] sm:$0xff] }
  0xae   : > { %v347_v0 = vpop.permute.xlu1 %346 }
  0xaf   : > { %v345_v1 = vpop.permute.xlu0 %344  ;;  %364 = vst.msk [vmem:[#allocation2 + $0x70] sm:$0xff] %vm356_vm3, %v347_v0 }
  0xb0   : > { %363 = vst.msk [vmem:[#allocation2 + $0x60] sm:$0xff] %vm356_vm3, %v345_v1  ;;  %692 = vrot.lane.b32.xlu1 %v1654_v62, %s1862_s30  ;;  %v1612_v62 = vld [vmem:[%s1908_s20 + $0xe8] sm:$0xff] }
  0xb1   : > { %684 = vrot.lane.b32.xlu0 %v1650_v63, %s1862_s30  ;;  %v1647_v1 = vld [vmem:[%s1908_s20 + $0x388] sm:$0xff] }
  0xb2   : > { %v385_v5 = vpop.permute.xlu1 %384 }
  0xb3   : > { %v383_v6 = vpop.permute.xlu0 %382  ;;  %408 = vst.msk [vmem:[#allocation2 + $0x10] sm:$0xff] %vm406_vm4, %v385_v5  ;;  %v1678_v5 = vld [vmem:[%s1908_s20 + $0x368] sm:$0xff] }
  0xb4   : > { %407 = vst.msk [vmem:[#allocation2] sm:$0xff] %vm406_vm4, %v383_v6  ;;  %890 = vrot.lane.b32.xlu1 %v1685_v3, %s1867_s13  ;;  %v1674_v6 = vld [vmem:[%s1908_s20 + $0x268] sm:$0xff] }
  0xb5   : > { %882 = vrot.lane.b32.xlu0 %v1681_v4, %s1867_s13 }
  0xb6   : > { %v389_v11 = vpop.permute.xlu1 %388 }
  0xb7   : > { %v387_v12 = vpop.permute.xlu0 %386  ;;  %410 = vst.msk [vmem:[#allocation2 + $0x30] sm:$0xff] %vm406_vm4, %v389_v11 }
  0xb8   : > { %409 = vst.msk [vmem:[#allocation2 + $0x20] sm:$0xff] %vm406_vm4, %v387_v12  ;;  %1107 = vrot.lane.b32.xlu1 %v1726_v9, %s1855_s23  ;;  %v1719_v9 = vld [vmem:[%s1908_s20 + $0x590] sm:$0xff] }
  0xb9   : > { %1099 = vrot.lane.b32.xlu0 %v1722_v10, %s1855_s23  ;;  %v1715_v10 = vld [vmem:[%s1908_s20 + $0x490] sm:$0xff] }
  0xba   : > { %v393_v16 = vpop.permute.xlu1 %392 }
  0xbb   : > { %v391_v17 = vpop.permute.xlu0 %390  ;;  %412 = vst.msk [vmem:[#allocation2 + $0x50] sm:$0xff] %vm406_vm4, %v393_v16 }
  0xbc   : > { %411 = vst.msk [vmem:[#allocation2 + $0x40] sm:$0xff] %vm406_vm4, %v391_v17  ;;  %1301 = vrot.lane.b32.xlu1 %v1757_v14, %s1859_s27  ;;  %v1746_v14 = vld [vmem:[%s1908_s20 + $0x470] sm:$0xff] }
  0xbd   : > { %1293 = vrot.lane.b32.xlu0 %v1753_v15, %s1859_s27  ;;  %v1624_v17 = vld [vmem:[%s1908_s20 + $0x1f0] sm:$0xff] }
  0xbe   : > { %v397_v22 = vpop.permute.xlu1 %396 }
  0xbf   : > { %v395_v23 = vpop.permute.xlu0 %394  ;;  %414 = vst.msk [vmem:[#allocation2 + $0x70] sm:$0xff] %vm406_vm4, %v397_v22  ;;  %v1651_v22 = vld [vmem:[%s1908_s20 + $0x290] sm:$0xff] }
  0xc0   : > { %413 = vst.msk [vmem:[#allocation2 + $0x60] sm:$0xff] %vm406_vm4, %v395_v23  ;;  %544 = vrot.lane.b32.xlu1 %v1631_v20, %s1859_s27 }
  0xc1   : > { %536 = vrot.lane.b32.xlu0 %v1627_v21, %s1859_s27  ;;  %v1655_v21 = vld [vmem:[%s1908_s20 + $0x390] sm:$0xff] }
  0xc2   : > { %v435_v28 = vpop.permute.xlu1 %434 }
  0xc3   : > { %v433_v29 = vpop.permute.xlu0 %432  ;;  %458 = vst.msk [vmem:[#allocation2 + $0x10] sm:$0xff] %vm456_vm5, %v435_v28 }
  0xc4   : > { %457 = vst.msk [vmem:[#allocation2] sm:$0xff] %vm456_vm5, %v433_v29  ;;  %742 = vrot.lane.b32.xlu1 %v1662_v25, %s1863_s5  ;;  %v1686_v25 = vld [vmem:[%s1908_s20 + $0x370] sm:$0xff] }
  0xc5   : > { %734 = vrot.lane.b32.xlu0 %v1658_v27, %s1863_s5  ;;  %v1682_v27 = vld [vmem:[%s1908_s20 + $0x270] sm:$0xff] }
  0xc6   : > { %v441_v34 = vpop.permute.xlu1 %440 }
  0xc7   : > { %v437_v35 = vpop.permute.xlu0 %436  ;;  %461 = vst.msk [vmem:[#allocation2 + $0x40] sm:$0xff] %vm456_vm5, %v441_v34  ;;  %v1758_v34 = vld [vmem:[%s1908_s20 + $0x578] sm:$0xff] }
  0xc8   : > { %459 = vst.msk [vmem:[#allocation2 + $0x20] sm:$0xff] %vm456_vm5, %v437_v35  ;;  %940 = vrot.lane.b32.xlu1 %v1693_v32, %s1868_s11  ;;  %v1754_v35 = vld [vmem:[%s1908_s20 + $0x478] sm:$0xff] }
  0xc9   : > { %932 = vrot.lane.b32.xlu0 %v1689_v33, %s1868_s11 }
  0xca   : > { %v491_v41 = vpop.permute.xlu1 %490 }
  0xcb   : > { %v483_v42 = vpop.permute.xlu0 %482  ;;  %511 = vst.msk [vmem:[#allocation2 + $0x40] sm:$0xff] %vm506_vm6, %v491_v41 }
  0xcc   : > { %507 = vst.msk [vmem:[#allocation2] sm:$0xff] %vm506_vm6, %v483_v42  ;;  %1156 = vrot.lane.b32.xlu1 %v1734_v38, %s1856_s24  ;;  %v1632_v38 = vld [vmem:[%s1908_s20 + $0x1f8] sm:$0xff] }
  0xcd   : > { %1148 = vrot.lane.b32.xlu0 %v1730_v39, %s1856_s24  ;;  %v1628_v39 = vld [vmem:[%s1908_s20 + $0xf8] sm:$0xff] }
  0xce   : > { %v541_v47 = vpop.permute.xlu1 %540  ;;  %v1663_v42 = vld [vmem:[%s1908_s20 + $0x398] sm:$0xff] }
  0xcf   : > { %v533_v48 = vpop.permute.xlu0 %532  ;;  %561 = vst.msk [vmem:[#allocation2 + $0x40] sm:$0xff] %vm556_vm7, %v541_v47  ;;  %v1690_v47 = vld [vmem:[%s1908_s20 + $0x278] sm:$0xff] }
  0xd0   : > { %557 = vst.msk [vmem:[#allocation2] sm:$0xff] %vm556_vm7, %v533_v48  ;;  %594 = vrot.lane.b32.xlu1 %v1639_v45, %s1860_s28 }
  0xd1   : > { %586 = vrot.lane.b32.xlu0 %v1635_v46, %s1860_s28  ;;  %v1694_v46 = vld [vmem:[%s1908_s20 + $0x378] sm:$0xff] }
  0xd2   : > { %v591_v52 = vpop.permute.xlu1 %590 }
  0xd3   : > { %v583_v53 = vpop.permute.xlu0 %582  ;;  %611 = vst.msk [vmem:[#allocation2 + $0x40] sm:$0xff] %vm606_vm8, %v591_v52  ;;  %v1731_v52 = vld [vmem:[%s1908_s20 + $0x4a0] sm:$0xff] }
  0xd4   : > { %607 = vst.msk [vmem:[#allocation2] sm:$0xff] %vm606_vm8, %v583_v53  ;;  %792 = vrot.lane.b32.xlu1 %v1670_v50, %s1864_s6  ;;  %v1704_v50 = vld [vmem:[%s1908_s20 + $0x5c0] sm:$0xff] }
  0xd5   : > { %784 = vrot.lane.b32.xlu0 %v1666_v51, %s1864_s6  ;;  %981 = vst.msk [vmem:[#allocation2 + $0x78] sm:$0xff] %vm206_vm0, %v1704_v50  ;;  %v1735_v51 = vld [vmem:[%s1908_s20 + $0x5a0] sm:$0xff] }
  0xd6   : > { %v1008_v56 = vpop.permute.xlu1 %1007  ;;  %v1700_v53 = vld [vmem:[%s1908_s20 + $0x4c0] sm:$0xff] }
  0xd7   : > { %v1000_v26 = vpop.permute.xlu0 %999  ;;  %1027 = vst.msk [vmem:[#allocation2 + $0x48] sm:$0xff] %vm256_vm1, %v1008_v56  ;;  %v1640_v56 = vld [vmem:[%s1908_s20 + $0x3c0] sm:$0xff] }
  0xd8   : > { %1023 = vst.msk [vmem:[#allocation2 + $0x8] sm:$0xff] %vm256_vm1, %v1000_v26  ;;  %1011 = vrot.lane.b32.xlu1 %v1711_v54, %s1853_s21  ;;  %v1636_v26 = vld [vmem:[%s1908_s20 + $0x2c0] sm:$0xff] }
  0xd9   : > { %1003 = vrot.lane.b32.xlu0 %v1707_v55, %s1853_s21  ;;  %977 = vst.msk [vmem:[#allocation2 + $0x38] sm:$0xff] %vm206_vm0, %v1700_v53  ;;  %vm956_vm0 = vcmask 1048512   ;;  %v1732_v53 = vld [vmem:[%s1908_s20 + $0x4e0] sm:$0xff] }
  0xda   : > { %v633_v59 = vpop.permute.xlu1 %632 }
  0xdb   : > { %v443_v60 = vpop.permute.xlu0 %442  ;;  %657 = vst.msk [vmem:[#allocation2] sm:$0xff] %vm656_vm9, %v633_v59  ;;  %v1671_v59 = vld [vmem:[%s1908_s20 + $0x3a0] sm:$0xff] }
  0xdc   : > { %462 = vst.msk [vmem:[#allocation2 + $0x50] sm:$0xff] %vm456_vm5, %v443_v60  ;;  %1205 = vrot.lane.b32.xlu1 %v1742_v57, %s1857_s25  ;;  %v1667_v60 = vld [vmem:[%s1908_s20 + $0x2a0] sm:$0xff] }
  0xdd   : > { %1197 = vrot.lane.b32.xlu0 %v1738_v58, %s1857_s25 }
  0xde   : > { %v1049_v63 = vpop.permute.xlu1 %1048 }
  0xdf   : > { %v641_v0 = vpop.permute.xlu0 %640  ;;  %1072 = vst.msk [vmem:[#allocation2 + $0x8] sm:$0xff] %vm306_vm2, %v1049_v63  ;;  %v1712_v63 = vld [vmem:[%s1908_s20 + $0x5c8] sm:$0xff] }
  0xe0   : > { %661 = vst.msk [vmem:[#allocation2 + $0x40] sm:$0xff] %vm656_vm9, %v641_v0  ;;  %446 = vrot.lane.b32.xlu1 %v1616_v61, %s1857_s25  ;;  %v1708_v0 = vld [vmem:[%s1908_s20 + $0x4c8] sm:$0xff] }
  0xe1   : > { %438 = vrot.lane.b32.xlu0 %v1612_v62, %s1857_s25 }
  0xe2   : > { %v485_v3 = vpop.permute.xlu1 %484 }
  0xe3   : > { %v1057_v4 = vpop.permute.xlu0 %1056  ;;  %508 = vst.msk [vmem:[#allocation2 + $0x10] sm:$0xff] %vm506_vm6, %v485_v3  ;;  %v1743_v3 = vld [vmem:[%s1908_s20 + $0x5a8] sm:$0xff] }
  0xe4   : > { %1076 = vst.msk [vmem:[#allocation2 + $0x48] sm:$0xff] %vm306_vm2, %v1057_v4  ;;  %644 = vrot.lane.b32.xlu1 %v1647_v1, %s1861_s29  ;;  %v1739_v4 = vld [vmem:[%s1908_s20 + $0x4a8] sm:$0xff] }
  0xe5   : > { %636 = vrot.lane.b32.xlu0 %v1643_v2, %s1861_s29 }
  0xe6   : > { %v683_v7 = vpop.permute.xlu1 %682 }
  0xe7   : > { %v493_v8 = vpop.permute.xlu0 %492  ;;  %707 = vst.msk [vmem:[#allocation2] sm:$0xff] %vm706_vm10, %v683_v7  ;;  %v1648_v7 = vld [vmem:[%s1908_s20 + $0x3c8] sm:$0xff] }
  0xe8   : > { %512 = vst.msk [vmem:[#allocation2 + $0x50] sm:$0xff] %vm506_vm6, %v493_v8  ;;  %842 = vrot.lane.b32.xlu1 %v1678_v5, %s1866_s8  ;;  %v1644_v8 = vld [vmem:[%s1908_s20 + $0x2c8] sm:$0xff] }
  0xe9   : > { %834 = vrot.lane.b32.xlu0 %v1674_v6, %s1866_s8 }
  0xea   : > { %v1098_v11 = vpop.permute.xlu1 %1097 }
  0xeb   : > { %v691_v12 = vpop.permute.xlu0 %690  ;;  %1121 = vst.msk [vmem:[#allocation2 + $0x8] sm:$0xff] %vm356_vm3, %v1098_v11  ;;  %v1679_v11 = vld [vmem:[%s1908_s20 + $0x3a8] sm:$0xff] }
  0xec   : > { %711 = vst.msk [vmem:[#allocation2 + $0x40] sm:$0xff] %vm706_vm10, %v691_v12  ;;  %1060 = vrot.lane.b32.xlu1 %v1719_v9, %s1854_s22  ;;  %v1675_v12 = vld [vmem:[%s1908_s20 + $0x2a8] sm:$0xff] }
  0xed   : > { %1052 = vrot.lane.b32.xlu0 %v1715_v10, %s1854_s22 }
  0xee   : > { %v535_v15 = vpop.permute.xlu1 %534 }
  0xef   : > { %v1106_v16 = vpop.permute.xlu0 %1105  ;;  %558 = vst.msk [vmem:[#allocation2 + $0x10] sm:$0xff] %vm556_vm7, %v535_v15  ;;  %v1720_v15 = vld [vmem:[%s1908_s20 + $0x5d0] sm:$0xff] }
  0xf0   : > { %1125 = vst.msk [vmem:[#allocation2 + $0x48] sm:$0xff] %vm356_vm3, %v1106_v16  ;;  %1254 = vrot.lane.b32.xlu1 %v1750_v13, %s1858_s26  ;;  %v1716_v16 = vld [vmem:[%s1908_s20 + $0x4d0] sm:$0xff] }
  0xf1   : > { %1246 = vrot.lane.b32.xlu0 %v1746_v14, %s1858_s26 }
  0xf2   : > { %v733_v19 = vpop.permute.xlu1 %732 }
  0xf3   : > { %v543_v20 = vpop.permute.xlu0 %542  ;;  %757 = vst.msk [vmem:[#allocation2] sm:$0xff] %vm2656_vm11, %v733_v19  ;;  %v1751_v19 = vld [vmem:[%s1908_s20 + $0x5b0] sm:$0xff] }
  0xf4   : > { %562 = vst.msk [vmem:[#allocation2 + $0x50] sm:$0xff] %vm556_vm7, %v543_v20  ;;  %496 = vrot.lane.b32.xlu1 %v1624_v17, %s1858_s26  ;;  %v1747_v20 = vld [vmem:[%s1908_s20 + $0x4b0] sm:$0xff] }
  0xf5   : > { %488 = vrot.lane.b32.xlu0 %v1620_v18, %s1858_s26 }
  0xf6   : > { %v1147_v23 = vpop.permute.xlu1 %1146 }
  0xf7   : > { %v741_v24 = vpop.permute.xlu0 %740  ;;  %1170 = vst.msk [vmem:[#allocation2 + $0x8] sm:$0xff] %vm406_vm4, %v1147_v23  ;;  %v1656_v23 = vld [vmem:[%s1908_s20 + $0x3d0] sm:$0xff] }
  0xf8   : > { %761 = vst.msk [vmem:[#allocation2 + $0x40] sm:$0xff] %vm2656_vm11, %v741_v24  ;;  %694 = vrot.lane.b32.xlu1 %v1655_v21, %s1862_s30  ;;  %v1652_v24 = vld [vmem:[%s1908_s20 + $0x2d0] sm:$0xff] }
  0xf9   : > { %686 = vrot.lane.b32.xlu0 %v1651_v22, %s1862_s30 }
  0xfa   : > { %v585_v28 = vpop.permute.xlu1 %584 }
  0xfb   : > { %v1155_v29 = vpop.permute.xlu0 %1154  ;;  %608 = vst.msk [vmem:[#allocation2 + $0x10] sm:$0xff] %vm606_vm8, %v585_v28 }
  0xfc   : > { %1174 = vst.msk [vmem:[#allocation2 + $0x48] sm:$0xff] %vm406_vm4, %v1155_v29  ;;  %892 = vrot.lane.b32.xlu1 %v1686_v25, %s1867_s13 }
  0xfd   : > { %884 = vrot.lane.b32.xlu0 %v1682_v27, %s1867_s13 }
  0xfe   : > { %v783_v32 = vpop.permute.xlu1 %782 }
  0xff   : > { %v593_v33 = vpop.permute.xlu0 %592  ;;  %807 = vst.msk [vmem:[#allocation2] sm:$0xff] %vm806_vm12, %v783_v32 }
 0x100   : > { %612 = vst.msk [vmem:[#allocation2 + $0x50] sm:$0xff] %vm606_vm8, %v593_v33  ;;  %1109 = vrot.lane.b32.xlu1 %v1727_v30, %s1855_s23  ;;  %v1687_v30 = vld [vmem:[%s1908_s20 + $0x3b0] sm:$0xff] }
 0x101   : > { %1101 = vrot.lane.b32.xlu0 %v1723_v31, %s1855_s23  ;;  %v1683_v31 = vld [vmem:[%s1908_s20 + $0x2b0] sm:$0xff] }
 0x102   : > { %v1002_v36 = vpop.permute.xlu1 %1001 }
 0x103   : > { %v791_v37 = vpop.permute.xlu0 %790  ;;  %1024 = vst.msk [vmem:[#allocation2 + $0x18] sm:$0xff] %vm256_vm1, %v1002_v36 }
 0x104   : > { %811 = vst.msk [vmem:[#allocation2 + $0x40] sm:$0xff] %vm806_vm12, %v791_v37  ;;  %1303 = vrot.lane.b32.xlu1 %v1758_v34, %s1859_s27  ;;  %v1728_v34 = vld [vmem:[%s1908_s20 + $0x5d8] sm:$0xff] }
 0x105   : > { %1295 = vrot.lane.b32.xlu0 %v1754_v35, %s1859_s27  ;;  %v1724_v35 = vld [vmem:[%s1908_s20 + $0x4d8] sm:$0xff] }
 0x106   : > { %v1196_v40 = vpop.permute.xlu1 %1195 }
 0x107   : > { %v1010_v41 = vpop.permute.xlu0 %1009  ;;  %1219 = vst.msk [vmem:[#allocation2 + $0x8] sm:$0xff] %vm456_vm5, %v1196_v40 }
 0x108   : > { %1028 = vst.msk [vmem:[#allocation2 + $0x58] sm:$0xff] %vm256_vm1, %v1010_v41  ;;  %546 = vrot.lane.b32.xlu1 %v1632_v38, %s1859_s27  ;;  %v1759_v38 = vld [vmem:[%s1908_s20 + $0x5b8] sm:$0xff] }
 0x109   : > { %538 = vrot.lane.b32.xlu0 %v1628_v39, %s1859_s27  ;;  %v1755_v39 = vld [vmem:[%s1908_s20 + $0x4b8] sm:$0xff] }
 0x10a   : > { %v445_v44 = vpop.permute.xlu1 %444 }
 0x10b   : > { %v1204_v45 = vpop.permute.xlu0 %1203  ;;  %463 = vst.msk [vmem:[#allocation2 + $0x60] sm:$0xff] %vm456_vm5, %v445_v44  ;;  %v1664_v44 = vld [vmem:[%s1908_s20 + $0x3d8] sm:$0xff] }
 0x10c   : > { %1223 = vst.msk [vmem:[#allocation2 + $0x48] sm:$0xff] %vm456_vm5, %v1204_v45  ;;  %744 = vrot.lane.b32.xlu1 %v1663_v42, %s1863_s5  ;;  %v1660_v45 = vld [vmem:[%s1908_s20 + $0x2d8] sm:$0xff] }
 0x10d   : > { %736 = vrot.lane.b32.xlu0 %v1659_v43, %s1863_s5 }
 0x10e   : > { %v643_v48 = vpop.permute.xlu1 %642 }
 0x10f   : > { %v635_v49 = vpop.permute.xlu0 %634  ;;  %662 = vst.msk [vmem:[#allocation2 + $0x50] sm:$0xff] %vm656_vm9, %v643_v48  ;;  %v1695_v48 = vld [vmem:[%s1908_s20 + $0x3b8] sm:$0xff] }
 0x110   : > { %658 = vst.msk [vmem:[#allocation2 + $0x10] sm:$0xff] %vm656_vm9, %v635_v49  ;;  %942 = vrot.lane.b32.xlu1 %v1694_v46, %s1868_s11  ;;  %v1691_v49 = vld [vmem:[%s1908_s20 + $0x2b8] sm:$0xff] }
 0x111   : > { %934 = vrot.lane.b32.xlu0 %v1690_v47, %s1868_s11 }
 0x112   : > { %v841_v54 = vpop.permute.xlu1 %840 }
 0x113   : > { %v833_v55 = vpop.permute.xlu0 %832  ;;  %861 = vst.msk [vmem:[#allocation2 + $0x40] sm:$0xff] %vm856_vm13, %v841_v54 }
 0x114   : > { %857 = vst.msk [vmem:[#allocation2] sm:$0xff] %vm856_vm13, %v833_v55  ;;  %1158 = vrot.lane.b32.xlu1 %v1735_v51, %s1856_s24 }
 0x115   : > { %1150 = vrot.lane.b32.xlu0 %v1731_v52, %s1856_s24  ;;  %v1736_v52 = vld [vmem:[%s1908_s20 + $0x5e0] sm:$0xff] }
 0x116   : > { %v1059_v57 = vpop.permute.xlu1 %1058 }
 0x117   : > { %v1051_v58 = vpop.permute.xlu0 %1050  ;;  %1077 = vst.msk [vmem:[#allocation2 + $0x58] sm:$0xff] %vm306_vm2, %v1059_v57 }
 0x118   : > { %1073 = vst.msk [vmem:[#allocation2 + $0x18] sm:$0xff] %vm306_vm2, %v1051_v58  ;;  %596 = vrot.lane.b32.xlu1 %v1640_v56, %s1860_s28  ;;  %v1672_v56 = vld [vmem:[%s1908_s20 + $0x3e0] sm:$0xff] }
 0x119   : > { %588 = vrot.lane.b32.xlu0 %v1636_v26, %s1860_s28  ;;  %v1668_v26 = vld [vmem:[%s1908_s20 + $0x2e0] sm:$0xff] }
 0x11a   : > { %v1253_v61 = vpop.permute.xlu1 %1252 }
 0x11b   : > { %v1245_v62 = vpop.permute.xlu0 %1244  ;;  %1272 = vst.msk [vmem:[#allocation2 + $0x48] sm:$0xff] %vm506_vm6, %v1253_v61 }
 0x11c   : > { %1268 = vst.msk [vmem:[#allocation2 + $0x8] sm:$0xff] %vm506_vm6, %v1245_v62  ;;  %794 = vrot.lane.b32.xlu1 %v1671_v59, %s1864_s6  ;;  %v1744_v59 = vld [vmem:[%s1908_s20 + $0x5e8] sm:$0xff] }
 0x11d   : > { %786 = vrot.lane.b32.xlu0 %v1667_v60, %s1864_s6  ;;  %v1740_v60 = vld [vmem:[%s1908_s20 + $0x4e8] sm:$0xff] }
 0x11e   : > { %v495_v1 = vpop.permute.xlu1 %494 }
 0x11f   : > { %v487_v2 = vpop.permute.xlu0 %486  ;;  %513 = vst.msk [vmem:[#allocation2 + $0x60] sm:$0xff] %vm506_vm6, %v495_v1 }
 0x120   : > { %509 = vst.msk [vmem:[#allocation2 + $0x20] sm:$0xff] %vm506_vm6, %v487_v2  ;;  %1013 = vrot.lane.b32.xlu1 %v1712_v63, %s1853_s21  ;;  %v1680_v63 = vld [vmem:[%s1908_s20 + $0x3e8] sm:$0xff] }
 0x121   : > { %1005 = vrot.lane.b32.xlu0 %v1708_v0, %s1853_s21  ;;  %v1676_v0 = vld [vmem:[%s1908_s20 + $0x2e8] sm:$0xff] }
 0x122   : > { %v693_v5 = vpop.permute.xlu1 %692 }
 0x123   : > { %v685_v6 = vpop.permute.xlu0 %684  ;;  %712 = vst.msk [vmem:[#allocation2 + $0x50] sm:$0xff] %vm706_vm10, %v693_v5 }
 0x124   : > { %708 = vst.msk [vmem:[#allocation2 + $0x10] sm:$0xff] %vm706_vm10, %v685_v6  ;;  %1207 = vrot.lane.b32.xlu1 %v1743_v3, %s1857_s25  ;;  %v1752_v3 = vld [vmem:[%s1908_s20 + $0x5f0] sm:$0xff] }
 0x125   : > { %1199 = vrot.lane.b32.xlu0 %v1739_v4, %s1857_s25  ;;  %v1748_v4 = vld [vmem:[%s1908_s20 + $0x4f0] sm:$0xff] }
 0x126   : > { %v891_v9 = vpop.permute.xlu1 %890 }
 0x127   : > { %v883_v10 = vpop.permute.xlu0 %882  ;;  %911 = vst.msk [vmem:[#allocation2 + $0x40] sm:$0xff] %vm906_vm14, %v891_v9 }
 0x128   : > { %907 = vst.msk [vmem:[#allocation2] sm:$0xff] %vm906_vm14, %v883_v10  ;;  %646 = vrot.lane.b32.xlu1 %v1648_v7, %s1861_s29  ;;  %v1688_v7 = vld [vmem:[%s1908_s20 + $0x3f0] sm:$0xff] }
 0x129   : > { %638 = vrot.lane.b32.xlu0 %v1644_v8, %s1861_s29  ;;  %v1684_v8 = vld [vmem:[%s1908_s20 + $0x2f0] sm:$0xff] }
 0x12a   : > { %v1108_v13 = vpop.permute.xlu1 %1107 }
 0x12b   : > { %v1100_v14 = vpop.permute.xlu0 %1099  ;;  %1126 = vst.msk [vmem:[#allocation2 + $0x58] sm:$0xff] %vm356_vm3, %v1108_v13 }
 0x12c   : > { %1122 = vst.msk [vmem:[#allocation2 + $0x18] sm:$0xff] %vm356_vm3, %v1100_v14  ;;  %844 = vrot.lane.b32.xlu1 %v1679_v11, %s1866_s8  ;;  %v1760_v11 = vld [vmem:[%s1908_s20 + $0x5f8] sm:$0xff] }
 0x12d   : > { %836 = vrot.lane.b32.xlu0 %v1675_v12, %s1866_s8  ;;  %v1756_v12 = vld [vmem:[%s1908_s20 + $0x4f8] sm:$0xff] }
 0x12e   : > { %v1302_v17 = vpop.permute.xlu1 %1301 }
 0x12f   : > { %v1294_v18 = vpop.permute.xlu0 %1293  ;;  %1321 = vst.msk [vmem:[#allocation2 + $0x48] sm:$0xff] %vm556_vm7, %v1302_v17 }
 0x130   : > { %1317 = vst.msk [vmem:[#allocation2 + $0x8] sm:$0xff] %vm556_vm7, %v1294_v18  ;;  %1062 = vrot.lane.b32.xlu1 %v1720_v15, %s1854_s22  ;;  %v1696_v15 = vld [vmem:[%s1908_s20 + $0x3f8] sm:$0xff] }
 0x131   : > { %1054 = vrot.lane.b32.xlu0 %v1716_v16, %s1854_s22  ;;  %v1692_v16 = vld [vmem:[%s1908_s20 + $0x2f8] sm:$0xff]  ;;  %s1820_s20 = smul.u32 72, %s2660_s16 }
 0x132   : > { %v545_v21 = vpop.permute.xlu1 %544 }
 0x133   : > { %v537_v22 = vpop.permute.xlu0 %536  ;;  %563 = vst.msk [vmem:[#allocation2 + $0x60] sm:$0xff] %vm556_vm7, %v545_v21 }
 0x134   : > { %559 = vst.msk [vmem:[#allocation2 + $0x20] sm:$0xff] %vm556_vm7, %v537_v22  ;;  %1256 = vrot.lane.b32.xlu1 %v1751_v19, %s1858_s26 }
 0x135   : > { %1248 = vrot.lane.b32.xlu0 %v1747_v20, %s1858_s26 }
 0x136   : > { %v743_v25 = vpop.permute.xlu1 %742  ;;  %v1334_v29 = vld [vmem:[#allocation2 + $0x48] sm:$0xff] }
 0x137   : > { %v735_v27 = vpop.permute.xlu0 %734  ;;  %v1326_v28 = vld [vmem:[#allocation2 + $0x8] sm:$0xff]  ;;  %762 = vst.msk [vmem:[#allocation2 + $0x50] sm:$0xff] %vm2656_vm11, %v743_v25  ;;  %1765 = vmatprep.mubr.msk.f32.mxu1 %vm1373_vm15, %v1334_v29 }
 0x138   : > { %758 = vst.msk [vmem:[#allocation2 + $0x10] sm:$0xff] %vm2656_vm11, %v735_v27  ;;  %1761 = vmatprep.mubr.msk.f32.mxu0 %vm1373_vm15, %v1326_v28  ;;  %696 = vrot.lane.b32.xlu1 %v1656_v23, %s1862_s30 }
 0x139   : > { %688 = vrot.lane.b32.xlu0 %v1652_v24, %s1862_s30 }
 0x13a   : > { %v941_v32 = vpop.permute.xlu1 %940 }
 0x13b   : > { %v933_v33 = vpop.permute.xlu0 %932  ;;  %961 = vst.msk [vmem:[#allocation2 + $0x40] sm:$0xff] %vm956_vm0, %v941_v32 }
 0x13c   : > { %957 = vst.msk [vmem:[#allocation2] sm:$0xff] %vm956_vm0, %v933_v33  ;;  %894 = vrot.lane.b32.xlu1 %v1687_v30, %s1867_s13 }
 0x13d   : > { %886 = vrot.lane.b32.xlu0 %v1683_v31, %s1867_s13 }
 0x13e   : > { %v1157_v36 = vpop.permute.xlu1 %1156 }
 0x13f   : > { %v1149_v37 = vpop.permute.xlu0 %1148  ;;  %1175 = vst.msk [vmem:[#allocation2 + $0x58] sm:$0xff] %vm406_vm4, %v1157_v36 }
 0x140   : > { %1171 = vst.msk [vmem:[#allocation2 + $0x18] sm:$0xff] %vm406_vm4, %v1149_v37  ;;  %1111 = vrot.lane.b32.xlu1 %v1728_v34, %s1855_s23  ;;  %v1503_v34 = vld [vmem:[%s2654_s3] sm:$0x1] }
 0x141   : > { %1103 = vrot.lane.b32.xlu0 %v1724_v35, %s1855_s23  ;;  %s2552_s23 = scalar_lea.vmem %s2655_s4, %s1820_s20 }
 0x142   : > { %v595_v40 = vpop.permute.xlu1 %594  ;;  %v1333_v43 = vld [vmem:[#allocation2 + $0x40] sm:$0xff] }
 0x143   : > { %v587_v41 = vpop.permute.xlu0 %586  ;;  %v1325_v42 = vld [vmem:[#allocation2] sm:$0xff]  ;;  %613 = vst.msk [vmem:[#allocation2 + $0x60] sm:$0xff] %vm606_vm8, %v595_v40  ;;  %1483 = vmatmul.mubr.f32.vlgmr.msra.gmra.mxu1 %v1333_v43 }
 0x144   : > { %609 = vst.msk [vmem:[#allocation2 + $0x20] sm:$0xff] %vm606_vm8, %v587_v41  ;;  %1463 = vmatmul.mubr.f32.vlgmr.msra.gmra.mxu0 %v1325_v42  ;;  %1305 = vrot.lane.b32.xlu1 %v1759_v38, %s1859_s27 }
 0x145   : > { %1297 = vrot.lane.b32.xlu0 %v1755_v39, %s1859_s27 }
 0x146   : > { %v793_v46 = vpop.permute.xlu1 %792 }
 0x147   : > { %v785_v47 = vpop.permute.xlu0 %784  ;;  %812 = vst.msk [vmem:[#allocation2 + $0x50] sm:$0xff] %vm806_vm12, %v793_v46 }
 0x148   : > { %808 = vst.msk [vmem:[#allocation2 + $0x10] sm:$0xff] %vm806_vm12, %v785_v47  ;;  %746 = vrot.lane.b32.xlu1 %v1664_v44, %s1863_s5 }
 0x149   : > { %738 = vrot.lane.b32.xlu0 %v1660_v45, %s1863_s5 }
 0x14a   : > { %v1012_v50 = vpop.permute.xlu1 %1011 }
 0x14b   : > { %v1004_v51 = vpop.permute.xlu0 %1003  ;;  %1029 = vst.msk [vmem:[#allocation2 + $0x68] sm:$0xff] %vm256_vm1, %v1012_v50 }
 0x14c   : > { %1025 = vst.msk [vmem:[#allocation2 + $0x28] sm:$0xff] %vm256_vm1, %v1004_v51  ;;  %944 = vrot.lane.b32.xlu1 %v1695_v48, %s1868_s11 }
 0x14d   : > { %936 = vrot.lane.b32.xlu0 %v1691_v49, %s1868_s11 }
 0x14e   : > { %v1206_v54 = vpop.permute.xlu1 %1205 }
 0x14f   : > { %v1198_v55 = vpop.permute.xlu0 %1197  ;;  %1224 = vst.msk [vmem:[#allocation2 + $0x58] sm:$0xff] %vm456_vm5, %v1206_v54 }
 0x150   : > { %1220 = vst.msk [vmem:[#allocation2 + $0x18] sm:$0xff] %vm456_vm5, %v1198_v55  ;;  %1160 = vrot.lane.b32.xlu1 %v1736_v52, %s1856_s24 }
 0x151   : > { %1152 = vrot.lane.b32.xlu0 %v1732_v53, %s1856_s24 }
 0x152   : > { %v447_v57 = vpop.permute.xlu1 %446 }
 0x153   : > { %v439_v58 = vpop.permute.xlu0 %438  ;;  %464 = vst.msk [vmem:[#allocation2 + $0x70] sm:$0xff] %vm456_vm5, %v447_v57 }
 0x154   : > { %460 = vst.msk [vmem:[#allocation2 + $0x30] sm:$0xff] %vm456_vm5, %v439_v58  ;;  %796 = vrot.lane.b32.xlu1 %v1672_v56, %s1864_s6 }
 0x155   : > { %788 = vrot.lane.b32.xlu0 %v1668_v26, %s1864_s6 }
 0x156   : > { %v645_v61 = vpop.permute.xlu1 %644 }
 0x157   : > { %v637_v62 = vpop.permute.xlu0 %636  ;;  %663 = vst.msk [vmem:[#allocation2 + $0x60] sm:$0xff] %vm656_vm9, %v645_v61 }
 0x158   : > { %659 = vst.msk [vmem:[#allocation2 + $0x20] sm:$0xff] %vm656_vm9, %v637_v62  ;;  %1209 = vrot.lane.b32.xlu1 %v1744_v59, %s1857_s25 }
 0x159   : > { %1201 = vrot.lane.b32.xlu0 %v1740_v60, %s1857_s25 }
 0x15a   : > { %v843_v1 = vpop.permute.xlu1 %842 }
 0x15b   : > { %v835_v2 = vpop.permute.xlu0 %834  ;;  %862 = vst.msk [vmem:[#allocation2 + $0x50] sm:$0xff] %vm856_vm13, %v843_v1 }
 0x15c   : > { %858 = vst.msk [vmem:[#allocation2 + $0x10] sm:$0xff] %vm856_vm13, %v835_v2  ;;  %846 = vrot.lane.b32.xlu1 %v1680_v63, %s1866_s8 }
 0x15d   : > { %838 = vrot.lane.b32.xlu0 %v1676_v0, %s1866_s8 }
 0x15e   : > { %v1061_v5 = vpop.permute.xlu1 %1060 }
 0x15f   : > { %v1053_v6 = vpop.permute.xlu0 %1052  ;;  %1078 = vst.msk [vmem:[#allocation2 + $0x68] sm:$0xff] %vm306_vm2, %v1061_v5 }
 0x160   : > { %1074 = vst.msk [vmem:[#allocation2 + $0x28] sm:$0xff] %vm306_vm2, %v1053_v6  ;;  %1258 = vrot.lane.b32.xlu1 %v1752_v3, %s1858_s26 }
 0x161   : > { %1250 = vrot.lane.b32.xlu0 %v1748_v4, %s1858_s26 }
 0x162   : > { %v1255_v9 = vpop.permute.xlu1 %1254 }
 0x163   : > { %v1247_v10 = vpop.permute.xlu0 %1246  ;;  %1273 = vst.msk [vmem:[#allocation2 + $0x58] sm:$0xff] %vm506_vm6, %v1255_v9 }
 0x164   : > { %1269 = vst.msk [vmem:[#allocation2 + $0x18] sm:$0xff] %vm506_vm6, %v1247_v10  ;;  %896 = vrot.lane.b32.xlu1 %v1688_v7, %s1867_s13 }
 0x165   : > { %888 = vrot.lane.b32.xlu0 %v1684_v8, %s1867_s13 }
 0x166   : > { %v497_v13 = vpop.permute.xlu1 %496 }
 0x167   : > { %v489_v14 = vpop.permute.xlu0 %488  ;;  %514 = vst.msk [vmem:[#allocation2 + $0x70] sm:$0xff] %vm506_vm6, %v497_v13 }
 0x168   : > { %510 = vst.msk [vmem:[#allocation2 + $0x30] sm:$0xff] %vm506_vm6, %v489_v14  ;;  %1307 = vrot.lane.b32.xlu1 %v1760_v11, %s1859_s27 }
 0x169   : > { %1299 = vrot.lane.b32.xlu0 %v1756_v12, %s1859_s27 }
 0x16a   : > { %v695_v17 = vpop.permute.xlu1 %694 }
 0x16b   : > { %v687_v18 = vpop.permute.xlu0 %686  ;;  %713 = vst.msk [vmem:[#allocation2 + $0x60] sm:$0xff] %vm706_vm10, %v695_v17 }
 0x16c   : > { %709 = vst.msk [vmem:[#allocation2 + $0x20] sm:$0xff] %vm706_vm10, %v687_v18  ;;  %946 = vrot.lane.b32.xlu1 %v1696_v15, %s1868_s11 }
 0x16d   : > { %938 = vrot.lane.b32.xlu0 %v1692_v16, %s1868_s11 }
 0x16e   : > { %v893_v19 = vpop.permute.xlu1 %892 }
 0x16f   : > { %v885_v20 = vpop.permute.xlu0 %884  ;;  %912 = vst.msk [vmem:[#allocation2 + $0x50] sm:$0xff] %vm906_vm14, %v893_v19 }
 0x170   : > { %908 = vst.msk [vmem:[#allocation2 + $0x10] sm:$0xff] %vm906_vm14, %v885_v20 }
 0x172   : > { %v1110_v21 = vpop.permute.xlu1 %1109 }
 0x173   : > { %v1102_v22 = vpop.permute.xlu0 %1101  ;;  %1127 = vst.msk [vmem:[#allocation2 + $0x68] sm:$0xff] %vm356_vm3, %v1110_v21 }
 0x174   : > { %1123 = vst.msk [vmem:[#allocation2 + $0x28] sm:$0xff] %vm356_vm3, %v1102_v22 }
 0x176   : > { %v1304_v23 = vpop.permute.xlu1 %1303 }
 0x177   : > { %v1296_v24 = vpop.permute.xlu0 %1295  ;;  %1322 = vst.msk [vmem:[#allocation2 + $0x58] sm:$0xff] %vm556_vm7, %v1304_v23 }
 0x178   : > { %1318 = vst.msk [vmem:[#allocation2 + $0x18] sm:$0xff] %vm556_vm7, %v1296_v24 }
 0x17a   : > { %v547_v25 = vpop.permute.xlu1 %546 }
 0x17b   : > { %v539_v27 = vpop.permute.xlu0 %538  ;;  %564 = vst.msk [vmem:[#allocation2 + $0x70] sm:$0xff] %vm556_vm7, %v547_v25 }
 0x17c   : > { %560 = vst.msk [vmem:[#allocation2 + $0x30] sm:$0xff] %vm556_vm7, %v539_v27  ;;  %v1365_v27 = vld [vmem:[%s2653_s2] sm:$0xff] }
 0x17e   : > { %v745_v28 = vpop.permute.xlu1 %744  ;;  %v1336_v31 = vld [vmem:[#allocation2 + $0x58] sm:$0xff] }
 0x17f   : > { %v737_v29 = vpop.permute.xlu0 %736  ;;  %v1328_v30 = vld [vmem:[#allocation2 + $0x18] sm:$0xff]  ;;  %763 = vst.msk [vmem:[#allocation2 + $0x60] sm:$0xff] %vm2656_vm11, %v745_v28  ;;  %1766 = vmatprep.mubr.msk.f32.mxu1 %vm1373_vm15, %v1336_v31  ;;  %v1369_v28 = vld [vmem:[%s2653_s2 + $0x20] sm:$0xff] }
 0x180   : > { %759 = vst.msk [vmem:[#allocation2 + $0x20] sm:$0xff] %vm2656_vm11, %v737_v29  ;;  %1762 = vmatprep.mubr.msk.f32.mxu0 %vm1373_vm15, %v1328_v30  ;;  %vm1504_vm11 = vcmask 24576  }
 0x181   : > { %1505 = vst.msk [vmem:[%s2552_s23] sm:$0x1] %vm1504_vm11, %v1503_v34 }
 0x182   : > { %v943_v32 = vpop.permute.xlu1 %942 }
 0x183   : > { %v935_v33 = vpop.permute.xlu0 %934  ;;  %962 = vst.msk [vmem:[#allocation2 + $0x50] sm:$0xff] %vm956_vm0, %v943_v32 }
 0x184   : > { %958 = vst.msk [vmem:[#allocation2 + $0x10] sm:$0xff] %vm956_vm0, %v935_v33 }
 0x186   : > { %v1159_v35 = vpop.permute.xlu1 %1158 }
 0x187   : > { %v1151_v36 = vpop.permute.xlu0 %1150  ;;  %1176 = vst.msk [vmem:[#allocation2 + $0x68] sm:$0xff] %vm406_vm4, %v1159_v35  ;;  %v1366_v35 = vld [vmem:[%s2653_s2 + $0x8] sm:$0xff] }
 0x188   : > { %1172 = vst.msk [vmem:[#allocation2 + $0x28] sm:$0xff] %vm406_vm4, %v1151_v36  ;;  %v1370_v36 = vld [vmem:[%s2653_s2 + $0x28] sm:$0xff] }
 0x18a   : > { %v597_v37 = vpop.permute.xlu1 %596  ;;  %v1335_v40 = vld [vmem:[#allocation2 + $0x50] sm:$0xff] }
 0x18b   : > { %v589_v38 = vpop.permute.xlu0 %588  ;;  %v1327_v39 = vld [vmem:[#allocation2 + $0x10] sm:$0xff]  ;;  %614 = vst.msk [vmem:[#allocation2 + $0x70] sm:$0xff] %vm606_vm8, %v597_v37  ;;  %1488 = vmatmul.mubr.f32.gmra.mxu1 %v1335_v40 }
 0x18c   : > { %610 = vst.msk [vmem:[#allocation2 + $0x30] sm:$0xff] %vm606_vm8, %v589_v38  ;;  %1468 = vmatmul.mubr.f32.gmra.mxu0 %v1327_v39 }
 0x18e   : > { %v795_v41 = vpop.permute.xlu1 %794 }
 0x18f   : > { %v787_v42 = vpop.permute.xlu0 %786  ;;  %813 = vst.msk [vmem:[#allocation2 + $0x60] sm:$0xff] %vm806_vm12, %v795_v41 }
 0x190   : > { %809 = vst.msk [vmem:[#allocation2 + $0x20] sm:$0xff] %vm806_vm12, %v787_v42 }
 0x192   : > { %v1014_v43 = vpop.permute.xlu1 %1013 }
 0x193   : > { %v1006_v44 = vpop.permute.xlu0 %1005  ;;  %1030 = vst.msk [vmem:[#allocation2 + $0x78] sm:$0xff] %vm256_vm1, %v1014_v43  ;;  %v1367_v43 = vld [vmem:[%s2653_s2 + $0x10] sm:$0xff] }
 0x194   : > { %1026 = vst.msk [vmem:[#allocation2 + $0x38] sm:$0xff] %vm256_vm1, %v1006_v44  ;;  %vm2657_vm1 = vcmask 786112   ;;  %v1371_v44 = vld [vmem:[%s2653_s2 + $0x30] sm:$0xff] }
 0x196   : > { %v1208_v45 = vpop.permute.xlu1 %1207 }
 0x197   : > { %v1200_v46 = vpop.permute.xlu0 %1199  ;;  %1225 = vst.msk [vmem:[#allocation2 + $0x68] sm:$0xff] %vm456_vm5, %v1208_v45 }
 0x198   : > { %1221 = vst.msk [vmem:[#allocation2 + $0x28] sm:$0xff] %vm456_vm5, %v1200_v46 }
 0x19a   : > { %v647_v47 = vpop.permute.xlu1 %646 }
 0x19b   : > { %v639_v48 = vpop.permute.xlu0 %638  ;;  %664 = vst.msk [vmem:[#allocation2 + $0x70] sm:$0xff] %vm656_vm9, %v647_v47 }
 0x19c   : > { %660 = vst.msk [vmem:[#allocation2 + $0x30] sm:$0xff] %vm656_vm9, %v639_v48 }
 0x19e   : > { %v845_v49 = vpop.permute.xlu1 %844 }
 0x19f   : > { %v837_v50 = vpop.permute.xlu0 %836  ;;  %863 = vst.msk [vmem:[#allocation2 + $0x60] sm:$0xff] %vm856_vm13, %v845_v49 }
 0x1a0   : > { %859 = vst.msk [vmem:[#allocation2 + $0x20] sm:$0xff] %vm856_vm13, %v837_v50 }
 0x1a2   : > { %v1063_v51 = vpop.permute.xlu1 %1062 }
 0x1a3   : > { %v1055_v52 = vpop.permute.xlu0 %1054  ;;  %1079 = vst.msk [vmem:[#allocation2 + $0x78] sm:$0xff] %vm306_vm2, %v1063_v51  ;;  %v1368_v51 = vld [vmem:[%s2653_s2 + $0x18] sm:$0xff] }
 0x1a4   : > { %1075 = vst.msk [vmem:[#allocation2 + $0x38] sm:$0xff] %vm306_vm2, %v1055_v52  ;;  %vm2658_vm2 = vmmov %vm2657_vm1  ;;  %v1372_v52 = vld [vmem:[%s2653_s2 + $0x38] sm:$0xff] }
 0x1a6   : > { %v1257_v53 = vpop.permute.xlu1 %1256 }
 0x1a7   : > { %v1249_v54 = vpop.permute.xlu0 %1248  ;;  %1274 = vst.msk [vmem:[#allocation2 + $0x68] sm:$0xff] %vm506_vm6, %v1257_v53 }
 0x1a8   : > { %1270 = vst.msk [vmem:[#allocation2 + $0x28] sm:$0xff] %vm506_vm6, %v1249_v54 }
 0x1aa   : > { %v697_v55 = vpop.permute.xlu1 %696 }
 0x1ab   : > { %v689_v56 = vpop.permute.xlu0 %688  ;;  %714 = vst.msk [vmem:[#allocation2 + $0x70] sm:$0xff] %vm706_vm10, %v697_v55 }
 0x1ac   : > { %710 = vst.msk [vmem:[#allocation2 + $0x30] sm:$0xff] %vm706_vm10, %v689_v56 }
 0x1ae   : > { %v895_v26 = vpop.permute.xlu1 %894 }
 0x1af   : > { %v887_v57 = vpop.permute.xlu0 %886  ;;  %913 = vst.msk [vmem:[#allocation2 + $0x60] sm:$0xff] %vm906_vm14, %v895_v26 }
 0x1b0   : > { %909 = vst.msk [vmem:[#allocation2 + $0x20] sm:$0xff] %vm906_vm14, %v887_v57 }
 0x1b2   : > { %v1112_v58 = vpop.permute.xlu1 %1111 }
 0x1b3   : > { %v1104_v59 = vpop.permute.xlu0 %1103  ;;  %1128 = vst.msk [vmem:[#allocation2 + $0x78] sm:$0xff] %vm356_vm3, %v1112_v58 }
 0x1b4   : > { %1124 = vst.msk [vmem:[#allocation2 + $0x38] sm:$0xff] %vm356_vm3, %v1104_v59  ;;  %vm1506_vm3 = vcmask 31744  }
 0x1b6   : > { %v1306_v60 = vpop.permute.xlu1 %1305 }
 0x1b7   : > { %v1298_v61 = vpop.permute.xlu0 %1297  ;;  %1323 = vst.msk [vmem:[#allocation2 + $0x68] sm:$0xff] %vm556_vm7, %v1306_v60 }
 0x1b8   : > { %1319 = vst.msk [vmem:[#allocation2 + $0x28] sm:$0xff] %vm556_vm7, %v1298_v61 }
 0x1ba   : > { %v747_v62 = vpop.permute.xlu1 %746 }
 0x1bb   : > { %v739_v63 = vpop.permute.xlu0 %738  ;;  %764 = vst.msk [vmem:[#allocation2 + $0x70] sm:$0xff] %vm2657_vm1, %v747_v62 }
 0x1bc   : > { %760 = vst.msk [vmem:[#allocation2 + $0x30] sm:$0xff] %vm2658_vm2, %v739_v63 }
 0x1be   : > { %v945_v0 = vpop.permute.xlu1 %944  ;;  %v1338_v3 = vld [vmem:[#allocation2 + $0x68] sm:$0xff] }
 0x1bf   : > { %v937_v1 = vpop.permute.xlu0 %936  ;;  %v1330_v2 = vld [vmem:[#allocation2 + $0x28] sm:$0xff]  ;;  %963 = vst.msk [vmem:[#allocation2 + $0x60] sm:$0xff] %vm956_vm0, %v945_v0  ;;  %1767 = vmatprep.mubr.msk.f32.mxu1 %vm1373_vm15, %v1338_v3 }
 0x1c0   : > { %959 = vst.msk [vmem:[#allocation2 + $0x20] sm:$0xff] %vm956_vm0, %v937_v1  ;;  %1763 = vmatprep.mubr.msk.f32.mxu0 %vm1373_vm15, %v1330_v2 }
 0x1c2   : > { %v1161_v4 = vpop.permute.xlu1 %1160 }
 0x1c3   : > { %v1153_v5 = vpop.permute.xlu0 %1152  ;;  %1177 = vst.msk [vmem:[#allocation2 + $0x78] sm:$0xff] %vm406_vm4, %v1161_v4 }
 0x1c4   : > { %1173 = vst.msk [vmem:[#allocation2 + $0x38] sm:$0xff] %vm406_vm4, %v1153_v5 }
 0x1c6   : > { %v797_v6 = vpop.permute.xlu1 %796  ;;  %v1337_v9 = vld [vmem:[#allocation2 + $0x60] sm:$0xff] }
 0x1c7   : > { %v789_v7 = vpop.permute.xlu0 %788  ;;  %v1329_v8 = vld [vmem:[#allocation2 + $0x20] sm:$0xff]  ;;  %814 = vst.msk [vmem:[#allocation2 + $0x70] sm:$0xff] %vm806_vm12, %v797_v6  ;;  %1493 = vmatmul.mubr.f32.gmra.mxu1 %v1337_v9 }
 0x1c8   : > { %810 = vst.msk [vmem:[#allocation2 + $0x30] sm:$0xff] %vm806_vm12, %v789_v7  ;;  %1473 = vmatmul.mubr.f32.gmra.mxu0 %v1329_v8 }
 0x1ca   : > { %v1210_v10 = vpop.permute.xlu1 %1209 }
 0x1cb   : > { %v1202_v11 = vpop.permute.xlu0 %1201  ;;  %1226 = vst.msk [vmem:[#allocation2 + $0x78] sm:$0xff] %vm456_vm5, %v1210_v10 }
 0x1cc   : > { %1222 = vst.msk [vmem:[#allocation2 + $0x38] sm:$0xff] %vm456_vm5, %v1202_v11 }
 0x1ce   : > { %v847_v12 = vpop.permute.xlu1 %846 }
 0x1cf   : > { %v839_v13 = vpop.permute.xlu0 %838  ;;  %864 = vst.msk [vmem:[#allocation2 + $0x70] sm:$0xff] %vm856_vm13, %v847_v12 }
 0x1d0   : > { %860 = vst.msk [vmem:[#allocation2 + $0x30] sm:$0xff] %vm856_vm13, %v839_v13 }
 0x1d2   : > { %v1259_v14 = vpop.permute.xlu1 %1258 }
 0x1d3   : > { %v1251_v15 = vpop.permute.xlu0 %1250  ;;  %1275 = vst.msk [vmem:[#allocation2 + $0x78] sm:$0xff] %vm506_vm6, %v1259_v14 }
 0x1d4   : > { %1271 = vst.msk [vmem:[#allocation2 + $0x38] sm:$0xff] %vm506_vm6, %v1251_v15 }
 0x1d6   : > { %v897_v16 = vpop.permute.xlu1 %896 }
 0x1d7   : > { %v889_v17 = vpop.permute.xlu0 %888  ;;  %914 = vst.msk [vmem:[#allocation2 + $0x70] sm:$0xff] %vm906_vm14, %v897_v16 }
 0x1d8   : > { %910 = vst.msk [vmem:[#allocation2 + $0x30] sm:$0xff] %vm906_vm14, %v889_v17 }
 0x1da   : > { %v1308_v18 = vpop.permute.xlu1 %1307 }
 0x1db   : > { %v1300_v19 = vpop.permute.xlu0 %1299  ;;  %1324 = vst.msk [vmem:[#allocation2 + $0x78] sm:$0xff] %vm556_vm7, %v1308_v18 }
 0x1dc   : > { %1320 = vst.msk [vmem:[#allocation2 + $0x38] sm:$0xff] %vm556_vm7, %v1300_v19 }
 0x1de   : > { %v947_v20 = vpop.permute.xlu1 %946 }
 0x1df   : > { %v939_v21 = vpop.permute.xlu0 %938  ;;  %964 = vst.msk [vmem:[#allocation2 + $0x70] sm:$0xff] %vm956_vm0, %v947_v20 }
 0x1e0   : > { %960 = vst.msk [vmem:[#allocation2 + $0x30] sm:$0xff] %vm956_vm0, %v939_v21 }
 0x1e2   : > { %v1340_v23 = vld [vmem:[#allocation2 + $0x78] sm:$0xff] }
 0x1e3   : > { %v1332_v22 = vld [vmem:[#allocation2 + $0x38] sm:$0xff]  ;;  %1768 = vmatprep.mubr.msk.f32.mxu1 %vm1373_vm15, %v1340_v23 }
 0x1e4   : > { %1764 = vmatprep.mubr.msk.f32.mxu0 %vm1373_vm15, %v1332_v22 }
 0x1e6   : > { %v1339_v25 = vld [vmem:[#allocation2 + $0x70] sm:$0xff] }
 0x1e7   : > { %v1331_v24 = vld [vmem:[#allocation2 + $0x30] sm:$0xff]  ;;  %1498 = vmatmul.mubr.f32.gmra.mxu1 %v1339_v25 }
 0x1e8   : > { %1478 = vmatmul.mubr.f32.gmra.mxu0 %v1331_v24 }
 0x203   : > { %v1484_v30 = vpop.f32.mrf.mxu1 }
 0x204   : > { %v1464_v29 = vpop.f32.mrf.mxu0  ;;  %v1485_v32 = vadd.f32 %v1484_v30, %v1369_v28 }
 0x205   : > { %v1465_v31 = vadd.f32 %v1464_v29, %v1365_v27  ;;  %v1486_v34 = vpop.f32.mrf.mxu1 }
 0x206   : > { %v1466_v33 = vpop.f32.mrf.mxu0  ;;  %1511 = vst.msk [vmem:[%s2552_s23 + $0x21] sm:$0xff] %vm1506_vm3, %v1485_v32 }
 0x207   : > { %1507 = vst.msk [vmem:[%s2552_s23 + $0x1] sm:$0xff] %vm1506_vm3, %v1465_v31 }
 0x24b   : > { %v1489_v38 = vpop.f32.mrf.mxu1 }
 0x24c   : > { %v1469_v37 = vpop.f32.mrf.mxu0  ;;  %v1490_v40 = vadd.f32 %v1489_v38, %v1370_v36 }
 0x24d   : > { %v1470_v39 = vadd.f32 %v1469_v37, %v1366_v35  ;;  %v1491_v42 = vpop.f32.mrf.mxu1 }
 0x24e   : > { %v1471_v41 = vpop.f32.mrf.mxu0  ;;  %1512 = vst.msk [vmem:[%s2552_s23 + $0x29] sm:$0xff] %vm1506_vm3, %v1490_v40 }
 0x24f   : > { %1508 = vst.msk [vmem:[%s2552_s23 + $0x9] sm:$0xff] %vm1506_vm3, %v1470_v39 }
 0x287   : > { %v1494_v46 = vpop.f32.mrf.mxu1 }
 0x288   : > { %v1474_v45 = vpop.f32.mrf.mxu0  ;;  %v1495_v48 = vadd.f32 %v1494_v46, %v1371_v44 }
 0x289   : > { %v1475_v47 = vadd.f32 %v1474_v45, %v1367_v43  ;;  %v1496_v50 = vpop.f32.mrf.mxu1 }
 0x28a   : > { %v1476_v49 = vpop.f32.mrf.mxu0  ;;  %1513 = vst.msk [vmem:[%s2552_s23 + $0x31] sm:$0xff] %vm1506_vm3, %v1495_v48 }
 0x28b   : > { %1509 = vst.msk [vmem:[%s2552_s23 + $0x11] sm:$0xff] %vm1506_vm3, %v1475_v47 }
 0x2a7   : > { %v1499_v54 = vpop.f32.mrf.mxu1 }
 0x2a8   : > { %v1479_v53 = vpop.f32.mrf.mxu0  ;;  %v1500_v56 = vadd.f32 %v1499_v54, %v1372_v52 }
 0x2a9   : > { %v1480_v55 = vadd.f32 %v1479_v53, %v1368_v51  ;;  %v1501_v57 = vpop.f32.mrf.mxu1 }
 0x2aa   : > { %v1481_v26 = vpop.f32.mrf.mxu0  ;;  %1514 = vst.msk [vmem:[%s2552_s23 + $0x39] sm:$0xff] %vm1506_vm3, %v1500_v56 }
 0x2ab   : > { %1510 = vst.msk [vmem:[%s2552_s23 + $0x19] sm:$0xff] %vm1506_vm3, %v1480_v55 }
 0x2ac PF: > { %s14_s15 = sadd.s32 1, %s1851_s15  }
 0x2ad   : > { %p11_p4 = scmp.ge.s32.totalorder %s14_s15, 4  }
 0x2af   :  { %13 = sbr.rel (!%p11_p4) target bundleno = 1 (0x1), region = 89 }

</bundles_post_ra>
